<compile_context>
chip_gen: v5e
topology: v5e:2x2
jax: 0.10.0
libtpu: 0.0.40
codegen_flags: <defaults>
</compile_context>

<pallas_src>
import functools

import jax
import jax.numpy as jnp
from jax import lax
from jax.experimental import pallas as pl
from jax.experimental.pallas import tpu as pltpu


# ------------------------------ fused kernel ------------------------------- #

def _fused_mha_kernel(xq_ref, xk_ref, xv_ref,
                      wq_ref, bq_ref, wk_ref, bk_ref, wv_ref, bv_ref,
                      wo_ref, bo_ref,
                      o_ref,
                      *, num_heads, d_head, scale):
    H, dh = num_heads, d_head
    f32 = jnp.float32
    dt = o_ref.dtype                 # storage/compute dtype for MXU operands
    Sgq = xq_ref.shape[0]            # query rows of this (batch, group) block
    Sgk = xk_ref.shape[0]            # key/value rows of this block
    Sq = H * Sgq                     # rows of the group's (Sq, dh) query matrix

    def project(x_ref, w_ref, b_ref, s=None):
        # (rows, D) @ (D, D): operands stay in storage dtype (bf16 stays bf16),
        # accumulation in f32 on the MXU.
        y = jnp.dot(x_ref[...], w_ref[...], preferred_element_type=f32)
        y = y + b_ref[...].astype(f32)
        if s is not None:
            y = y * s                # fold 1/sqrt(d_head) into q (incl. bias)
        return y.astype(dt)

    yq = project(xq_ref, wq_ref, bq_ref, scale)     # (Sgq, D)
    yk = project(xk_ref, wk_ref, bk_ref)            # (Sgk, D)
    yv = project(xv_ref, wv_ref, bv_ref)            # (Sgk, D)

    # torch's .view(B*H, -1, dh) makes this group's (Sq, dh) query matrix a
    # pure row-major regroup of the (Sgq, D) slab.  We process its rows in the
    # permuted order  h*Sgq + r  <->  view row r*H + h  (softmax / attention
    # are row-permutation equivariant; the permutation is undone at the merge
    # below), so the "head split" is H whole-block lane slices stacked along
    # sublanes -- no per-element copies, no scratch.
    q_p = jnp.concatenate([yq[:, h * dh:(h + 1) * dh] for h in range(H)],
                          axis=0)                    # (Sq, dh)

    # Flash-style online softmax over the H key/value head chunks (zero-copy
    # lane slices of yk / yv).  Live state is O(Sq*(Sgk + dh)) f32 instead of
    # a full (Sq, Sk) score matrix.
    m_i = jnp.full((Sq, 1), -jnp.inf, f32)
    l_i = jnp.zeros((Sq, 1), f32)
    acc = jnp.zeros((Sq, dh), f32)
    for h2 in range(H):                              # H whole-block steps
        k_h = yk[:, h2 * dh:(h2 + 1) * dh]           # (Sgk, dh)
        v_h = yv[:, h2 * dh:(h2 + 1) * dh]           # (Sgk, dh)
        s = lax.dot_general(q_p, k_h, (((1,), (1,)), ((), ())),
                            preferred_element_type=f32)     # (Sq, Sgk)
        m_new = jnp.maximum(m_i, jnp.max(s, axis=-1, keepdims=True))
        a = jnp.exp(m_i - m_new)
        p = jnp.exp(s - m_new)
        l_i = a * l_i + jnp.sum(p, axis=-1, keepdims=True)
        acc = a * acc + jnp.dot(p.astype(dt), v_h, preferred_element_type=f32)
        m_i = m_new

    attended = (acc * pl.reciprocal(l_i, approx=True)).astype(dt)   # (Sq, dh)

    # Inverse regroup as a register value (no VMEM round trip): permuted head
    # block h maps to lanes [h*dh, (h+1)*dh) of the output row block.  The
    # lane-dense (Sgq, D) slab feeds one full-depth MXU matmul.
    att2d = jnp.concatenate(
        [attended[h * Sgq:(h + 1) * Sgq, :] for h in range(H)], axis=-1)  # (Sgq, D)

    out = jnp.dot(att2d, wo_ref[...], preferred_element_type=f32)
    o_ref[...] = (out + bo_ref[...].astype(f32)).astype(o_ref.dtype)


# ------------------------------ module wrapper ------------------------------ #

def init_mha_params(key, d_model, dtype=jnp.float32):
    """Deterministic init. Weights stored as (in, out) so kernel computes x @ W + b."""
    ks = jax.random.split(key, 8)
    bound = 1.0 / (d_model ** 0.5)

    def u(k, shape):
        return jax.random.uniform(k, shape, dtype, minval=-bound, maxval=bound)

    return {
        "wq": u(ks[0], (d_model, d_model)), "bq": u(ks[1], (d_model,)),
        "wk": u(ks[2], (d_model, d_model)), "bk": u(ks[3], (d_model,)),
        "wv": u(ks[4], (d_model, d_model)), "bv": u(ks[5], (d_model,)),
        "wo": u(ks[6], (d_model, d_model)), "bo": u(ks[7], (d_model,)),
    }


def multi_head_attention(params, query, key, value, num_heads, mask=None):
    # TODO(synk): optional mask path (masked_fill) not implemented; the module's
    # default forward uses mask=None.
    assert mask is None
    B, Sq, D = query.shape
    Sk = key.shape[1]
    assert D % num_heads == 0, "d_model must be divisible by num_heads"
    # torch's row-major .view makes each head group a contiguous row block of
    # the (S, D) slab only when num_heads | S.
    # TODO(synk): general (num_heads ∤ seq_len) case needs ragged row blocks.
    assert Sq % num_heads == 0 and Sk % num_heads == 0
    d_head = D // num_heads
    Sgq, Sgk = Sq // num_heads, Sk // num_heads
    scale = 1.0 / (d_head ** 0.5)
    dt = query.dtype

    kernel = functools.partial(_fused_mha_kernel, num_heads=num_heads,
                               d_head=d_head, scale=scale)

    itemsize = jnp.dtype(dt).itemsize
    flops = 2 * B * (2 * Sq + 2 * Sk) * D * D + 4 * B * Sq * Sk * D
    transcendentals = B * num_heads * (Sq * Sk + (num_heads + 1) * Sq)
    bytes_accessed = itemsize * (B * (2 * Sq + 2 * Sk) * D + 4 * D * D + 4 * D)
    cost = pl.CostEstimate(flops=int(flops),
                           transcendentals=int(transcendentals),
                           bytes_accessed=int(bytes_accessed))

    const = lambda b, g: (0, 0)
    w_spec = pl.BlockSpec((D, D), const)
    b_spec = pl.BlockSpec((1, D), const)

    def row_block(rows):
        # Leading batch dim squeezed out of the kernel refs.
        return pl.BlockSpec((None, rows, D), lambda b, g: (b, g, 0))

    return pl.pallas_call(
        kernel,
        out_shape=jax.ShapeDtypeStruct((B, Sq, D), dt),
        grid=(B, num_heads),
        in_specs=[
            row_block(Sgq),            # query rows of group g
            row_block(Sgk),            # key rows of group g
            row_block(Sgk),            # value rows of group g
            w_spec, b_spec, w_spec, b_spec, w_spec, b_spec, w_spec, b_spec,
        ],
        out_specs=row_block(Sgq),
        compiler_params=pltpu.CompilerParams(
            dimension_semantics=("parallel", "parallel"),
            vmem_limit_bytes=64 * 1024 * 1024),
        cost_estimate=cost,
    )(query, key, value,
      params["wq"], params["bq"].reshape(1, D),
      params["wk"], params["bk"].reshape(1, D),
      params["wv"], params["bv"].reshape(1, D),
      params["wo"], params["bo"].reshape(1, D))


# ------------------------------ reference (JAX) ----------------------------- #

def reference_mha(params, query, key, value, num_heads):
    B, Sq, D = query.shape
    d_head = D // num_heads
    q = (query.reshape(-1, D) @ params["wq"] + params["bq"]).reshape(B * num_heads, -1, d_head)
    k = (key.reshape(-1, D) @ params["wk"] + params["bk"]).reshape(B * num_heads, -1, d_head)
    v = (value.reshape(-1, D) @ params["wv"] + params["bv"]).reshape(B * num_heads, -1, d_head)
    scores = jnp.einsum("gqd,gkd->gqk", q, k) / (d_head ** 0.5)
    weights = jax.nn.softmax(scores, axis=-1)
    attended = jnp.einsum("gqk,gkd->gqd", weights, v).reshape(B, -1, D)
    return (attended.reshape(-1, D) @ params["wo"] + params["bo"]).reshape(B, -1, D)


if __name__ == "__main__":
    # Small but tile-friendly shapes: S // H = 16 rows per group keeps every
    # row block aligned to the f32 (8) and bf16 (16) sublane tiles, and D is
    # the full lane extent of every block.
    B, S, D, H = 2, 64, 64, 4      # d_head = 16, rows per group = 16

    root = jax.random.PRNGKey(0)
    kp, kq, kk, kv = jax.random.split(root, 4)
    params = init_mha_params(kp, D)
    query = jax.random.normal(kq, (B, S, D), jnp.float32)
    key_in = jax.random.normal(kk, (B, S, D), jnp.float32)
    value = jax.random.normal(kv, (B, S, D), jnp.float32)

    # float32 path (tight check against the plain-JAX reference).
    out = multi_head_attention(params, query, key_in, value, H)
    out = jax.block_until_ready(out)
    ref = reference_mha(params, query, key_in, value, H)
    assert out.shape == (B, S, D), out.shape
    # pl.reciprocal(approx=True) contributes ~1e-3 relative error to the
    # softmax normalization; layout/regroup bugs would be O(1) errors.
    assert jnp.allclose(out, ref, atol=5e-3, rtol=5e-3), "f32 mismatch vs reference"

    # bf16 path: MXU operands stay bf16 (f32 accumulation), loose tolerance.
    bf16 = jnp.bfloat16
    params_bf = jax.tree_util.tree_map(lambda x: x.astype(bf16), params)
    out_bf = multi_head_attention(params_bf, query.astype(bf16),
                                  key_in.astype(bf16), value.astype(bf16), H)
    out_bf = jax.block_until_ready(out_bf)
    assert out_bf.shape == (B, S, D) and out_bf.dtype == bf16
    assert jnp.allclose(out_bf.astype(jnp.float32), ref, atol=1e-1, rtol=1e-1), \
        "bf16 mismatch vs reference"

    print("KERNEL_OK")
</pallas_src>

<mosaic_0001>
module attributes {stable_mosaic.version = 11 : i64} {
  func.func @_fused_mha_kernel(%arg0: i32, %arg1: i32, %arg2: memref<1x16x64xf32, #tpu.memory_space<vmem>>, %arg3: memref<1x16x64xf32, #tpu.memory_space<vmem>>, %arg4: memref<1x16x64xf32, #tpu.memory_space<vmem>>, %arg5: memref<64x64xf32, #tpu.memory_space<vmem>>, %arg6: memref<1x64xf32, #tpu.memory_space<vmem>>, %arg7: memref<64x64xf32, #tpu.memory_space<vmem>>, %arg8: memref<1x64xf32, #tpu.memory_space<vmem>>, %arg9: memref<64x64xf32, #tpu.memory_space<vmem>>, %arg10: memref<1x64xf32, #tpu.memory_space<vmem>>, %arg11: memref<64x64xf32, #tpu.memory_space<vmem>>, %arg12: memref<1x64xf32, #tpu.memory_space<vmem>>, %arg13: memref<1x16x64xf32, #tpu.memory_space<vmem>>) attributes {dimension_semantics = [#tpu.dimension_semantics<parallel>, #tpu.dimension_semantics<parallel>], iteration_bounds = array<i64: 2, 4>, scalar_prefetch = 0 : i64, scratch_operands = 0 : i64, tpu.core_type = #tpu.core_type<tc>, window_params = [{transform_indices = @transform_0, window_bounds = array<i64: 1, 16, 64>}, {transform_indices = @transform_1, window_bounds = array<i64: 1, 16, 64>}, {transform_indices = @transform_2, window_bounds = array<i64: 1, 16, 64>}, {pipeline_mode = #tpu.pipeline_mode<synchronous>, transform_indices = @transform_3, window_bounds = array<i64: 64, 64>}, {pipeline_mode = #tpu.pipeline_mode<synchronous>, transform_indices = @transform_4, window_bounds = array<i64: 1, 64>}, {pipeline_mode = #tpu.pipeline_mode<synchronous>, transform_indices = @transform_5, window_bounds = array<i64: 64, 64>}, {pipeline_mode = #tpu.pipeline_mode<synchronous>, transform_indices = @transform_6, window_bounds = array<i64: 1, 64>}, {pipeline_mode = #tpu.pipeline_mode<synchronous>, transform_indices = @transform_7, window_bounds = array<i64: 64, 64>}, {pipeline_mode = #tpu.pipeline_mode<synchronous>, transform_indices = @transform_8, window_bounds = array<i64: 1, 64>}, {pipeline_mode = #tpu.pipeline_mode<synchronous>, transform_indices = @transform_9, window_bounds = array<i64: 64, 64>}, {pipeline_mode = #tpu.pipeline_mode<synchronous>, transform_indices = @transform_10, window_bounds = array<i64: 1, 64>}, {transform_indices = @transform_11, window_bounds = array<i64: 1, 16, 64>}]} {
    %c0 = arith.constant 0 : index
    %c0_0 = arith.constant 0 : index
    %c0_1 = arith.constant 0 : index
    %0 = vector.load %arg2[%c0, %c0_0, %c0_1] : memref<1x16x64xf32, #tpu.memory_space<vmem>>, vector<1x16x64xf32>
    %1 = vector.shape_cast %0 : vector<1x16x64xf32> to vector<16x64xf32>
    %c0_2 = arith.constant 0 : index
    %c0_3 = arith.constant 0 : index
    %2 = vector.load %arg5[%c0_2, %c0_3] : memref<64x64xf32, #tpu.memory_space<vmem>>, vector<64x64xf32>
    %cst = arith.constant dense<0.000000e+00> : vector<16x64xf32>
    %3 = tpu.matmul %1, %2, %cst {dimension_numbers = #tpu.dot_dimension_numbers<[1], [0], [0], [1], [0, 0, 1, 1], [], []>} : vector<16x64xf32>, vector<64x64xf32>, vector<16x64xf32> -> vector<16x64xf32>
    %c0_4 = arith.constant 0 : index
    %c0_5 = arith.constant 0 : index
    %4 = vector.load %arg6[%c0_4, %c0_5] : memref<1x64xf32, #tpu.memory_space<vmem>>, vector<1x64xf32>
    %5 = vector.broadcast %4 : vector<1x64xf32> to vector<16x64xf32>
    %6 = arith.addf %3, %5 : vector<16x64xf32>
    %cst_6 = arith.constant 2.500000e-01 : f32
    %7 = vector.broadcast %cst_6 : f32 to vector<16x64xf32>
    %8 = arith.mulf %6, %7 : vector<16x64xf32>
    %c0_7 = arith.constant 0 : index
    %c0_8 = arith.constant 0 : index
    %c0_9 = arith.constant 0 : index
    %9 = vector.load %arg3[%c0_7, %c0_8, %c0_9] : memref<1x16x64xf32, #tpu.memory_space<vmem>>, vector<1x16x64xf32>
    %10 = vector.shape_cast %9 : vector<1x16x64xf32> to vector<16x64xf32>
    %c0_10 = arith.constant 0 : index
    %c0_11 = arith.constant 0 : index
    %11 = vector.load %arg7[%c0_10, %c0_11] : memref<64x64xf32, #tpu.memory_space<vmem>>, vector<64x64xf32>
    %cst_12 = arith.constant dense<0.000000e+00> : vector<16x64xf32>
    %12 = tpu.matmul %10, %11, %cst_12 {dimension_numbers = #tpu.dot_dimension_numbers<[1], [0], [0], [1], [0, 0, 1, 1], [], []>} : vector<16x64xf32>, vector<64x64xf32>, vector<16x64xf32> -> vector<16x64xf32>
    %c0_13 = arith.constant 0 : index
    %c0_14 = arith.constant 0 : index
    %13 = vector.load %arg8[%c0_13, %c0_14] : memref<1x64xf32, #tpu.memory_space<vmem>>, vector<1x64xf32>
    %14 = vector.broadcast %13 : vector<1x64xf32> to vector<16x64xf32>
    %15 = arith.addf %12, %14 : vector<16x64xf32>
    %c0_15 = arith.constant 0 : index
    %c0_16 = arith.constant 0 : index
    %c0_17 = arith.constant 0 : index
    %16 = vector.load %arg4[%c0_15, %c0_16, %c0_17] : memref<1x16x64xf32, #tpu.memory_space<vmem>>, vector<1x16x64xf32>
    %17 = vector.shape_cast %16 : vector<1x16x64xf32> to vector<16x64xf32>
    %c0_18 = arith.constant 0 : index
    %c0_19 = arith.constant 0 : index
    %18 = vector.load %arg9[%c0_18, %c0_19] : memref<64x64xf32, #tpu.memory_space<vmem>>, vector<64x64xf32>
    %cst_20 = arith.constant dense<0.000000e+00> : vector<16x64xf32>
    %19 = tpu.matmul %17, %18, %cst_20 {dimension_numbers = #tpu.dot_dimension_numbers<[1], [0], [0], [1], [0, 0, 1, 1], [], []>} : vector<16x64xf32>, vector<64x64xf32>, vector<16x64xf32> -> vector<16x64xf32>
    %c0_21 = arith.constant 0 : index
    %c0_22 = arith.constant 0 : index
    %20 = vector.load %arg10[%c0_21, %c0_22] : memref<1x64xf32, #tpu.memory_space<vmem>>, vector<1x64xf32>
    %21 = vector.broadcast %20 : vector<1x64xf32> to vector<16x64xf32>
    %22 = arith.addf %19, %21 : vector<16x64xf32>
    %23 = vector.extract_strided_slice %8 {offsets = [0, 0], sizes = [16, 16], strides = [1, 1]} : vector<16x64xf32> to vector<16x16xf32>
    %24 = vector.extract_strided_slice %8 {offsets = [0, 16], sizes = [16, 16], strides = [1, 1]} : vector<16x64xf32> to vector<16x16xf32>
    %25 = vector.extract_strided_slice %8 {offsets = [0, 32], sizes = [16, 16], strides = [1, 1]} : vector<16x64xf32> to vector<16x16xf32>
    %26 = vector.extract_strided_slice %8 {offsets = [0, 48], sizes = [16, 16], strides = [1, 1]} : vector<16x64xf32> to vector<16x16xf32>
    %27 = tpu.concatenate %23, %24, %25, %26 in 0 : vector<16x16xf32>, vector<16x16xf32>, vector<16x16xf32>, vector<16x16xf32> -> vector<64x16xf32>
    %cst_23 = arith.constant 0xFF800000 : f32
    %28 = vector.broadcast %cst_23 : f32 to vector<64x1xf32>
    %cst_24 = arith.constant 0.000000e+00 : f32
    %29 = vector.broadcast %cst_24 : f32 to vector<64x1xf32>
    %cst_25 = arith.constant 0.000000e+00 : f32
    %30 = vector.broadcast %cst_25 : f32 to vector<64x16xf32>
    %31 = vector.extract_strided_slice %15 {offsets = [0, 0], sizes = [16, 16], strides = [1, 1]} : vector<16x64xf32> to vector<16x16xf32>
    %32 = vector.extract_strided_slice %22 {offsets = [0, 0], sizes = [16, 16], strides = [1, 1]} : vector<16x64xf32> to vector<16x16xf32>
    %cst_26 = arith.constant dense<0.000000e+00> : vector<64x16xf32>
    %33 = tpu.matmul %27, %31, %cst_26 {dimension_numbers = #tpu.dot_dimension_numbers<[1], [1], [0], [0], [0, 0, 1, 0], [], []>} : vector<64x16xf32>, vector<16x16xf32>, vector<64x16xf32> -> vector<64x16xf32>
    %cst_27 = arith.constant dense<0xFF800000> : vector<64xf32>
    %34 = vector.multi_reduction <maximumf>, %33, %cst_27 [1] : vector<64x16xf32> to vector<64xf32>
    %35 = vector.shape_cast %34 : vector<64xf32> to vector<64x1xf32>
    %36 = arith.maximumf %28, %35 : vector<64x1xf32>
    %37 = arith.subf %28, %36 : vector<64x1xf32>
    %38 = math.exp %37 : vector<64x1xf32>
    %39 = vector.broadcast %36 : vector<64x1xf32> to vector<64x16xf32>
    %40 = arith.subf %33, %39 : vector<64x16xf32>
    %41 = math.exp %40 : vector<64x16xf32>
    %42 = arith.mulf %38, %29 : vector<64x1xf32>
    %cst_28 = arith.constant dense<0.000000e+00> : vector<64xf32>
    %43 = vector.multi_reduction <add>, %41, %cst_28 [1] : vector<64x16xf32> to vector<64xf32>
    %44 = vector.shape_cast %43 : vector<64xf32> to vector<64x1xf32>
    %45 = arith.addf %42, %44 : vector<64x1xf32>
    %46 = vector.broadcast %38 : vector<64x1xf32> to vector<64x16xf32>
    %47 = arith.mulf %46, %30 : vector<64x16xf32>
    %cst_29 = arith.constant dense<0.000000e+00> : vector<64x16xf32>
    %48 = tpu.matmul %41, %32, %cst_29 {dimension_numbers = #tpu.dot_dimension_numbers<[1], [0], [0], [1], [0, 0, 1, 1], [], []>} : vector<64x16xf32>, vector<16x16xf32>, vector<64x16xf32> -> vector<64x16xf32>
    %49 = arith.addf %47, %48 : vector<64x16xf32>
    %50 = vector.extract_strided_slice %15 {offsets = [0, 16], sizes = [16, 16], strides = [1, 1]} : vector<16x64xf32> to vector<16x16xf32>
    %51 = vector.extract_strided_slice %22 {offsets = [0, 16], sizes = [16, 16], strides = [1, 1]} : vector<16x64xf32> to vector<16x16xf32>
    %cst_30 = arith.constant dense<0.000000e+00> : vector<64x16xf32>
    %52 = tpu.matmul %27, %50, %cst_30 {dimension_numbers = #tpu.dot_dimension_numbers<[1], [1], [0], [0], [0, 0, 1, 0], [], []>} : vector<64x16xf32>, vector<16x16xf32>, vector<64x16xf32> -> vector<64x16xf32>
    %cst_31 = arith.constant dense<0xFF800000> : vector<64xf32>
    %53 = vector.multi_reduction <maximumf>, %52, %cst_31 [1] : vector<64x16xf32> to vector<64xf32>
    %54 = vector.shape_cast %53 : vector<64xf32> to vector<64x1xf32>
    %55 = arith.maximumf %36, %54 : vector<64x1xf32>
    %56 = arith.subf %36, %55 : vector<64x1xf32>
    %57 = math.exp %56 : vector<64x1xf32>
    %58 = vector.broadcast %55 : vector<64x1xf32> to vector<64x16xf32>
    %59 = arith.subf %52, %58 : vector<64x16xf32>
    %60 = math.exp %59 : vector<64x16xf32>
    %61 = arith.mulf %57, %45 : vector<64x1xf32>
    %cst_32 = arith.constant dense<0.000000e+00> : vector<64xf32>
    %62 = vector.multi_reduction <add>, %60, %cst_32 [1] : vector<64x16xf32> to vector<64xf32>
    %63 = vector.shape_cast %62 : vector<64xf32> to vector<64x1xf32>
    %64 = arith.addf %61, %63 : vector<64x1xf32>
    %65 = vector.broadcast %57 : vector<64x1xf32> to vector<64x16xf32>
    %66 = arith.mulf %65, %49 : vector<64x16xf32>
    %cst_33 = arith.constant dense<0.000000e+00> : vector<64x16xf32>
    %67 = tpu.matmul %60, %51, %cst_33 {dimension_numbers = #tpu.dot_dimension_numbers<[1], [0], [0], [1], [0, 0, 1, 1], [], []>} : vector<64x16xf32>, vector<16x16xf32>, vector<64x16xf32> -> vector<64x16xf32>
    %68 = arith.addf %66, %67 : vector<64x16xf32>
    %69 = vector.extract_strided_slice %15 {offsets = [0, 32], sizes = [16, 16], strides = [1, 1]} : vector<16x64xf32> to vector<16x16xf32>
    %70 = vector.extract_strided_slice %22 {offsets = [0, 32], sizes = [16, 16], strides = [1, 1]} : vector<16x64xf32> to vector<16x16xf32>
    %cst_34 = arith.constant dense<0.000000e+00> : vector<64x16xf32>
    %71 = tpu.matmul %27, %69, %cst_34 {dimension_numbers = #tpu.dot_dimension_numbers<[1], [1], [0], [0], [0, 0, 1, 0], [], []>} : vector<64x16xf32>, vector<16x16xf32>, vector<64x16xf32> -> vector<64x16xf32>
    %cst_35 = arith.constant dense<0xFF800000> : vector<64xf32>
    %72 = vector.multi_reduction <maximumf>, %71, %cst_35 [1] : vector<64x16xf32> to vector<64xf32>
    %73 = vector.shape_cast %72 : vector<64xf32> to vector<64x1xf32>
    %74 = arith.maximumf %55, %73 : vector<64x1xf32>
    %75 = arith.subf %55, %74 : vector<64x1xf32>
    %76 = math.exp %75 : vector<64x1xf32>
    %77 = vector.broadcast %74 : vector<64x1xf32> to vector<64x16xf32>
    %78 = arith.subf %71, %77 : vector<64x16xf32>
    %79 = math.exp %78 : vector<64x16xf32>
    %80 = arith.mulf %76, %64 : vector<64x1xf32>
    %cst_36 = arith.constant dense<0.000000e+00> : vector<64xf32>
    %81 = vector.multi_reduction <add>, %79, %cst_36 [1] : vector<64x16xf32> to vector<64xf32>
    %82 = vector.shape_cast %81 : vector<64xf32> to vector<64x1xf32>
    %83 = arith.addf %80, %82 : vector<64x1xf32>
    %84 = vector.broadcast %76 : vector<64x1xf32> to vector<64x16xf32>
    %85 = arith.mulf %84, %68 : vector<64x16xf32>
    %cst_37 = arith.constant dense<0.000000e+00> : vector<64x16xf32>
    %86 = tpu.matmul %79, %70, %cst_37 {dimension_numbers = #tpu.dot_dimension_numbers<[1], [0], [0], [1], [0, 0, 1, 1], [], []>} : vector<64x16xf32>, vector<16x16xf32>, vector<64x16xf32> -> vector<64x16xf32>
    %87 = arith.addf %85, %86 : vector<64x16xf32>
    %88 = vector.extract_strided_slice %15 {offsets = [0, 48], sizes = [16, 16], strides = [1, 1]} : vector<16x64xf32> to vector<16x16xf32>
    %89 = vector.extract_strided_slice %22 {offsets = [0, 48], sizes = [16, 16], strides = [1, 1]} : vector<16x64xf32> to vector<16x16xf32>
    %cst_38 = arith.constant dense<0.000000e+00> : vector<64x16xf32>
    %90 = tpu.matmul %27, %88, %cst_38 {dimension_numbers = #tpu.dot_dimension_numbers<[1], [1], [0], [0], [0, 0, 1, 0], [], []>} : vector<64x16xf32>, vector<16x16xf32>, vector<64x16xf32> -> vector<64x16xf32>
    %cst_39 = arith.constant dense<0xFF800000> : vector<64xf32>
    %91 = vector.multi_reduction <maximumf>, %90, %cst_39 [1] : vector<64x16xf32> to vector<64xf32>
    %92 = vector.shape_cast %91 : vector<64xf32> to vector<64x1xf32>
    %93 = arith.maximumf %74, %92 : vector<64x1xf32>
    %94 = arith.subf %74, %93 : vector<64x1xf32>
    %95 = math.exp %94 : vector<64x1xf32>
    %96 = vector.broadcast %93 : vector<64x1xf32> to vector<64x16xf32>
    %97 = arith.subf %90, %96 : vector<64x16xf32>
    %98 = math.exp %97 : vector<64x16xf32>
    %99 = arith.mulf %95, %83 : vector<64x1xf32>
    %cst_40 = arith.constant dense<0.000000e+00> : vector<64xf32>
    %100 = vector.multi_reduction <add>, %98, %cst_40 [1] : vector<64x16xf32> to vector<64xf32>
    %101 = vector.shape_cast %100 : vector<64xf32> to vector<64x1xf32>
    %102 = arith.addf %99, %101 : vector<64x1xf32>
    %103 = vector.broadcast %95 : vector<64x1xf32> to vector<64x16xf32>
    %104 = arith.mulf %103, %87 : vector<64x16xf32>
    %cst_41 = arith.constant dense<0.000000e+00> : vector<64x16xf32>
    %105 = tpu.matmul %98, %89, %cst_41 {dimension_numbers = #tpu.dot_dimension_numbers<[1], [0], [0], [1], [0, 0, 1, 1], [], []>} : vector<64x16xf32>, vector<16x16xf32>, vector<64x16xf32> -> vector<64x16xf32>
    %106 = arith.addf %104, %105 : vector<64x16xf32>
    %107 = tpu.reciprocal %102 {approx = true} : vector<64x1xf32> -> vector<64x1xf32>
    %108 = vector.broadcast %107 : vector<64x1xf32> to vector<64x16xf32>
    %109 = arith.mulf %106, %108 : vector<64x16xf32>
    %110 = vector.extract_strided_slice %109 {offsets = [0, 0], sizes = [16, 16], strides = [1, 1]} : vector<64x16xf32> to vector<16x16xf32>
    %111 = vector.extract_strided_slice %109 {offsets = [16, 0], sizes = [16, 16], strides = [1, 1]} : vector<64x16xf32> to vector<16x16xf32>
    %112 = vector.extract_strided_slice %109 {offsets = [32, 0], sizes = [16, 16], strides = [1, 1]} : vector<64x16xf32> to vector<16x16xf32>
    %113 = vector.extract_strided_slice %109 {offsets = [48, 0], sizes = [16, 16], strides = [1, 1]} : vector<64x16xf32> to vector<16x16xf32>
    %114 = tpu.concatenate %110, %111, %112, %113 in 1 : vector<16x16xf32>, vector<16x16xf32>, vector<16x16xf32>, vector<16x16xf32> -> vector<16x64xf32>
    %c0_42 = arith.constant 0 : index
    %c0_43 = arith.constant 0 : index
    %115 = vector.load %arg11[%c0_42, %c0_43] : memref<64x64xf32, #tpu.memory_space<vmem>>, vector<64x64xf32>
    %cst_44 = arith.constant dense<0.000000e+00> : vector<16x64xf32>
    %116 = tpu.matmul %114, %115, %cst_44 {dimension_numbers = #tpu.dot_dimension_numbers<[1], [0], [0], [1], [0, 0, 1, 1], [], []>} : vector<16x64xf32>, vector<64x64xf32>, vector<16x64xf32> -> vector<16x64xf32>
    %c0_45 = arith.constant 0 : index
    %c0_46 = arith.constant 0 : index
    %117 = vector.load %arg12[%c0_45, %c0_46] : memref<1x64xf32, #tpu.memory_space<vmem>>, vector<1x64xf32>
    %118 = vector.broadcast %117 : vector<1x64xf32> to vector<16x64xf32>
    %119 = arith.addf %116, %118 : vector<16x64xf32>
    %c0_47 = arith.constant 0 : index
    %c0_48 = arith.constant 0 : index
    %c0_49 = arith.constant 0 : index
    %120 = vector.load %arg13[%c0_47, %c0_48, %c0_49] : memref<1x16x64xf32, #tpu.memory_space<vmem>>, vector<1x16x64xf32>
    %121 = vector.shape_cast %120 : vector<1x16x64xf32> to vector<16x64xf32>
    %122 = vector.shape_cast %119 : vector<16x64xf32> to vector<1x16x64xf32>
    tpu.vector_store %arg13[%c0_47, %c0_48, %c0_49], %122 {strides = array<i32>} : memref<1x16x64xf32, #tpu.memory_space<vmem>>, vector<1x16x64xf32>,
    return
  }
  func.func @transform_0(%arg0: i32, %arg1: i32) -> (i32, i32, i32) {
    %c0_i32 = arith.constant 0 : i32
    %c0_i32_0 = arith.constant 0 : i32
    return %arg0, %arg1, %c0_i32 : i32, i32, i32
  }
  func.func @transform_1(%arg0: i32, %arg1: i32) -> (i32, i32, i32) {
    %c0_i32 = arith.constant 0 : i32
    %c0_i32_0 = arith.constant 0 : i32
    return %arg0, %arg1, %c0_i32 : i32, i32, i32
  }
  func.func @transform_2(%arg0: i32, %arg1: i32) -> (i32, i32, i32) {
    %c0_i32 = arith.constant 0 : i32
    %c0_i32_0 = arith.constant 0 : i32
    return %arg0, %arg1, %c0_i32 : i32, i32, i32
  }
  func.func @transform_3(%arg0: i32, %arg1: i32) -> (i32, i32) {
    %c0_i32 = arith.constant 0 : i32
    %c0_i32_0 = arith.constant 0 : i32
    %c0_i32_1 = arith.constant 0 : i32
    return %c0_i32, %c0_i32_0 : i32, i32
  }
  func.func @transform_4(%arg0: i32, %arg1: i32) -> (i32, i32) {
    %c0_i32 = arith.constant 0 : i32
    %c0_i32_0 = arith.constant 0 : i32
    %c0_i32_1 = arith.constant 0 : i32
    return %c0_i32, %c0_i32_0 : i32, i32
  }
  func.func @transform_5(%arg0: i32, %arg1: i32) -> (i32, i32) {
    %c0_i32 = arith.constant 0 : i32
    %c0_i32_0 = arith.constant 0 : i32
    %c0_i32_1 = arith.constant 0 : i32
    return %c0_i32, %c0_i32_0 : i32, i32
  }
  func.func @transform_6(%arg0: i32, %arg1: i32) -> (i32, i32) {
    %c0_i32 = arith.constant 0 : i32
    %c0_i32_0 = arith.constant 0 : i32
    %c0_i32_1 = arith.constant 0 : i32
    return %c0_i32, %c0_i32_0 : i32, i32
  }
  func.func @transform_7(%arg0: i32, %arg1: i32) -> (i32, i32) {
    %c0_i32 = arith.constant 0 : i32
    %c0_i32_0 = arith.constant 0 : i32
    %c0_i32_1 = arith.constant 0 : i32
    return %c0_i32, %c0_i32_0 : i32, i32
  }
  func.func @transform_8(%arg0: i32, %arg1: i32) -> (i32, i32) {
    %c0_i32 = arith.constant 0 : i32
    %c0_i32_0 = arith.constant 0 : i32
    %c0_i32_1 = arith.constant 0 : i32
    return %c0_i32, %c0_i32_0 : i32, i32
  }
  func.func @transform_9(%arg0: i32, %arg1: i32) -> (i32, i32) {
    %c0_i32 = arith.constant 0 : i32
    %c0_i32_0 = arith.constant 0 : i32
    %c0_i32_1 = arith.constant 0 : i32
    return %c0_i32, %c0_i32_0 : i32, i32
  }
  func.func @transform_10(%arg0: i32, %arg1: i32) -> (i32, i32) {
    %c0_i32 = arith.constant 0 : i32
    %c0_i32_0 = arith.constant 0 : i32
    %c0_i32_1 = arith.constant 0 : i32
    return %c0_i32, %c0_i32_0 : i32, i32
  }
  func.func @transform_11(%arg0: i32, %arg1: i32) -> (i32, i32, i32) {
    %c0_i32 = arith.constant 0 : i32
    %c0_i32_0 = arith.constant 0 : i32
    return %arg0, %arg1, %c0_i32 : i32, i32, i32
  }
}

</mosaic_0001>

<bundles_post_ra>
// kernel: tpu_custom_call.1
= control target key start
LH: loop header
LB: loop body
LE: loop exit
PB: predicated region body
PF: predicated region fallthrough
CT: control target
= control target key end

     0   :  { %s3830_s0 = inlined_call_operand.hbm [shape: f32[2,64,64], index: 0, kind: input, shape index: {}]   ;;  %s3831_s1 = inlined_call_operand.hbm [shape: f32[2,64,64], index: 1, kind: input, shape index: {}]   ;;  %s3832_s2 = inlined_call_operand.hbm [shape: f32[2,64,64], index: 2, kind: input, shape index: {}]   ;;  %s3833_s3 = inlined_call_operand.hbm [shape: f32[64,64], index: 3, kind: input, shape index: {}]   ;;  %s3834_s4 = inlined_call_operand.vmem [shape: f32[1,64], index: 4, kind: input, shape index: {}]   ;;  %s3835_s5 = inlined_call_operand.hbm [shape: f32[64,64], index: 5, kind: input, shape index: {}]   ;;  %s3836_s6 = inlined_call_operand.vmem [shape: f32[1,64], index: 6, kind: input, shape index: {}]   ;;  %s3837_s7 = inlined_call_operand.hbm [shape: f32[64,64], index: 7, kind: input, shape index: {}]   ;;  %s3838_s8 = inlined_call_operand.vmem [shape: f32[1,64], index: 8, kind: input, shape index: {}]   ;;  %s3839_s9 = inlined_call_operand.hbm [shape: f32[64,64], index: 9, kind: input, shape index: {}]   ;;  %s3840_s10 = inlined_call_operand.vmem [shape: f32[1,64], index: 10, kind: input, shape index: {}]   ;;  %s3841_s11 = inlined_call_operand.hbm [shape: f32[2,64,64], index: 11, kind: output, shape index: {}]  }
   0x1   :  { %3855 = sst [smem:[#allocation28_spill]] %s3831_s1 }
   0x2   :  { %3856 = sst [smem:[#allocation29_spill]] %s3833_s3 }
   0x3   :  { %3857 = sst [smem:[#allocation30_spill]] %s3835_s5 }
   0x4   :  { %3858 = sst [smem:[#allocation31_spill]] %s3837_s7 }
   0x5   :  { %3859 = sst [smem:[#allocation32_spill]] %s3838_s8 }
   0x6   :  { %3860 = sst [smem:[#allocation33_spill]] %s3839_s9 }
   0x7   :  { %3861 = sst [smem:[#allocation34_spill]] %s3840_s10 }
   0x8   :  { %3862 = sst [smem:[#allocation35_spill]] %s3841_s11 }
   0x9   :  { %16 = vsyncpa [#allocation3], 0 }
   0xa   :  { %18 = vsyncpa [#allocation3 + $0x1], 0 }
   0xb   :  { %19 = vsyncpa [#allocation6], 0 }
   0xc   :  { %21 = vsyncpa [#allocation6 + $0x1], 0 }
   0xd   :  { %22 = vsyncpa [#allocation9], 0 }
   0xe   :  { %23 = vsyncpa [#allocation12], 0 }
   0xf   :  { %24 = vsyncpa [#allocation4], 0 }
  0x10   :  { %26 = vsyncpa [#allocation4 + $0x1], 0  ;;  %s2848_s17 = smov 0   ;;  %s2850_s18 = smov 0  }
  0x11   :  { %s2852_s19 = smov 0   ;;  %s2854_s20 = smov 0  }
  0x12   :  { %s2856_s21 = smov 0   ;;  %s2858_s22 = smov 0  }
  0x13   :  { %s2860_s23 = smov 0   ;;  %s2862_s24 = smov 0  }
  0x14 LB: > { %3863 = sst [smem:[#allocation20_spill]] %s2744_s17  ;;  %s2889_s25 = sadd.s32 4294967295, %s2772_s24   ;;  %s2772_s24 = sphi %s2862_s24, %s32_s24   ;;  %s2768_s23 = sphi %s2860_s23, %s3915_s23   ;;  %s2764_s22 = sphi %s2858_s22, %s3909_s22   ;;  %s2760_s21 = sphi %s2856_s21, %s3914_s21   ;;  %s2756_s20 = sphi %s2854_s20, %s3908_s20   ;;  %s2752_s19 = sphi %s2852_s19, %s3913_s19   ;;  %s2748_s18 = sphi %s2850_s18, %s3912_s18   ;;  %s2744_s17 = sphi %s2848_s17, %s3911_s17  }
  0x15   : > { %3864 = sst [smem:[#allocation21_spill]] %s2756_s20  ;;  %s2036_s26 = sadd.s32 4294967294, %s2772_s24  }
  0x16   : > { %3865 = sst [smem:[#allocation22_spill]] %s2760_s21  ;;  %p66_p0 = scmp.ne.s32.totalorder %s2748_s18, %s2744_s17 }
  0x17   : > { %3866 = sst [smem:[#allocation23_spill]] %s2764_s22  ;;  %p67_p1 = scmp.eq.s32.totalorder %s2889_s25, 0 }
  0x18   : > { %p316_p2 = scmp.eq.s32.totalorder %s2889_s25, 7  ;;  %p322_p3 = scmp.eq.s32.totalorder %s2036_s26, 7 }
  0x19   : > { %p2898_p4 = por %p67_p1, %p66_p0  ;;  %p2037_p5 = scmp.ge.s32.totalorder %s2772_s24, 1 }
  0x1a   : > { %p2903_p6 = por %p322_p3, %p66_p0  ;;  %p329_p7 = scmp.lt.s32.totalorder %s2772_s24, 9 }
  0x1b   : > { %s3870_s3 = sld [smem:[#allocation29_spill]]  ;;  %s2774_s14 = smov [#allocation8]  }
  0x1c   : > { %s3868_s28 = scalar_select %p2903_p6, 1, 0 }
  0x1d   : > { %p2911_p8 = pnand %p2037_p5, %p329_p7  ;;  %s342_s15 = sshll.u32 %s2774_s14, 4  ;;  %s343_s15 = int_to_ptr.vmem [resolvable:$true] %s342_s15 }
  0x1e   : > { %3869 = sst [smem:[#allocation24_spill]] %s3868_s28  ;;  %s3846_s14 = smov 8  }
  0x1f   : > { %p2174_p9 = pneg %p2911_p8  ;;  %s3873_s7 = sld [smem:[#allocation31_spill]] }
  0x20   : > { %s2777_s28 = smov [#allocation11]   ;;  %s41_s26 = sadd.s32 1, %s2764_s22 }
  0x21   : > { %s340_s12 = sshll.u32 %s3870_s3, 4  ;;  %p2919_p10 = pnand %p2174_p9, %p67_p1  ;;  %s341_s12 = int_to_ptr.hbm [resolvable:$true] %s340_s12 }
  0x22   : > { %s3844_s3 = smov 128   ;;  %s376_s17 = sshll.u32 %s2777_s28, 4  ;;  %s377_s17 = int_to_ptr.vmem [resolvable:$true] %s376_s17 }
  0x23   : > { %2177 = dma.hbm_to_vmem [thread:$0]  (!%p2919_p10), %s341_s12, 1024, %s343_s15, [#allocation9], %s3844_s3, %s3844_s3, %s3846_s14  }
  0x24   : > { %s44_s29 = sadd.s32 1, %s2768_s23  ;;  %p42_p11 = scmp.ge.s32.totalorder %s41_s26, 4 }
  0x25   : > { %s374_s30 = sshll.u32 %s3873_s7, 4  ;;  %s53_s7 = sadd.s32 1, %s2752_s19  ;;  %s375_s30 = int_to_ptr.hbm [resolvable:$true] %s374_s30 }
  0x26   : > { %2183 = dma.hbm_to_vmem [thread:$0]  (!%p2919_p10), %s375_s30, 1024, %s377_s17, [#allocation12], %s3844_s3, %s3844_s3, %s3846_s14  }
  0x27   : > { %p60_p12 = scmp.ne.s32.totalorder %s2752_s19, %s2748_s18  ;;  %p61_p13 = scmp.eq.s32.totalorder %s2772_s24, 0 }
  0x28   : > { %s3917_s26 = smov (%p42_p11, %s41_s26), 0  ;;  %s3919_s29 = smov (!%p42_p11, %s44_s29), %s2768_s23 }
  0x29   : > { %3874 = sst [smem:[#allocation25_spill]] %s3917_s26  ;;  %s49_s28 = ssub.s32 %s2764_s22, %s3917_s26 }
  0x2a   : > { %p2947_p0 = por %p61_p13, %p60_p12  ;;  %p46_p3 = scmp.ge.s32.totalorder %s3919_s29, 2 }
  0x2b   : > { %p2953_p5 = por %p316_p2, %p60_p12  ;;  %p2205_p7 = scmp.lt.s32.totalorder %s2772_s24, 8 }
  0x2c   : > { %s3852_s15 = sand.u32 1, %s2752_s19   ;;  %s3921_s29 = smov (%p46_p3, %s3919_s29), 0 }
  0x2d   : > { %s3876_s17 = scalar_select %p2953_p5, 1, 0 }
  0x2e   : > { %3878 = sst [smem:[#allocation27_spill]] %s3921_s29  ;;  %s2963_s30 = sshll.u32 %s3852_s15, 4 }
  0x2f   : > { %3877 = sst [smem:[#allocation26_spill]] %s3876_s17  ;;  %s2044_s3 = sshll.u32 %s2764_s22, 1 }
  0x30   : > { %s48_s14 = ssub.s32 %s2768_s23, %s3921_s29  ;;  %s2045_s26 = sshll.u32 %s2768_s23, 3 }
  0x31   : > { %s50_s11 = sor.u32 %s49_s28, %s48_s14  ;;  %s419_s10 = sadd.s32 %s2045_s26, %s2044_s3 }
  0x32   : > { %p51_p9 = scmp.eq.s32.totalorder %s50_s11, 0  ;;  %s2969_s21 = sshll.u32 %s419_s10, 3 }
  0x33   : > { %p2973_p2 = pnand %p2205_p7, %p2947_p0  ;;  %s434_s20 = sand.u32 1, %s2772_s24  }
  0x34   : > { %s2979_s15 = scalar_select %p51_p9, %s2752_s19, %s53_s7  }
  0x35   : > { %s3880_s1 = sld [smem:[#allocation28_spill]]  ;;  %s438_s3 = scalar_lea.vmem [#allocation5], %s2963_s30 }
  0x36   : > { %s448_s11 = sshll.u32 %s438_s3, 4  ;;  %s2986_s10 = scalar_lea.sflag [#allocation6], %s434_s20  ;;  %s449_s11 = int_to_ptr.vmem [resolvable:$true] %s448_s11 }
  0x37   : > { %s3881_s26 = smov 8   ;;  %s3882_s28 = smov 128  }
  0x38   : > { %s3883_s5 = sld [smem:[#allocation30_spill]]  ;;  %s2778_s22 = smov [#allocation10]  }
  0x39   : > { %s3884_s9 = sld [smem:[#allocation33_spill]]  ;;  %s421_s12 = scalar_lea.hbm %s3830_s0, %s2969_s21 }
  0x3b   : > { %s445_s29 = scalar_lea.hbm %s3880_s1, %s2969_s21 }
  0x3c   : > { %s446_s14 = sshll.u32 %s445_s29, 4  ;;  %s359_s29 = sshll.u32 %s2778_s22, 4  ;;  %s447_s14 = int_to_ptr.hbm [resolvable:$true] %s446_s14  ;;  %s360_s29 = int_to_ptr.vmem [resolvable:$true] %s359_s29 }
  0x3d   : > { %2193 = dma.hbm_to_vmem [thread:$0]  (!%p2973_p2), %s447_s14, 256, %s449_s11, %s2986_s10, %s3882_s28, %s3882_s28, %s3881_s26  }
  0x3e   : > { %s357_s8 = sshll.u32 %s3883_s5, 4  ;;  %s2779_s14 = smov [#allocation13]   ;;  %s358_s8 = int_to_ptr.hbm [resolvable:$true] %s357_s8 }
  0x3f   : > { %s391_s20 = sshll.u32 %s3884_s9, 4  ;;  %s393_s11 = sshll.u32 %s2779_s14, 4  ;;  %s392_s20 = int_to_ptr.hbm [resolvable:$true] %s391_s20  ;;  %s394_s11 = int_to_ptr.vmem [resolvable:$true] %s393_s11 }
  0x40   : > { %2180 = dma.hbm_to_vmem [thread:$0]  (!%p2919_p10), %s358_s8, 1024, %s360_s29, [#allocation9], %s3882_s28, %s3882_s28, %s3881_s26  }
  0x41   : > { %2186 = dma.hbm_to_vmem [thread:$0]  (!%p2919_p10), %s392_s20, 1024, %s394_s11, [#allocation12], %s3882_s28, %s3882_s28, %s3881_s26  }
  0x42   : > { %s414_s22 = scalar_lea.vmem [#allocation2], %s2963_s30  ;;  %s422_s5 = sshll.u32 %s421_s12, 4  ;;  %s423_s5 = int_to_ptr.hbm [resolvable:$true] %s422_s5 }
  0x43   : > { %s424_s3 = sshll.u32 %s414_s22, 4  ;;  %s3885_s8 = sand.u32 1, %s2752_s19   ;;  %s425_s3 = int_to_ptr.vmem [resolvable:$true] %s424_s3 }
  0x44   : > { %s411_s29 = scalar_lea.sflag [#allocation3], %s3885_s8  ;;  %s469_s20 = scalar_lea.hbm %s3832_s2, %s2969_s21 }
  0x45   : > { %2190 = dma.hbm_to_vmem [thread:$0]  (!%p2973_p2), %s423_s5, 256, %s425_s3, %s411_s29, %s3882_s28, %s3882_s28, %s3881_s26  }
  0x46   : > { %s462_s11 = scalar_lea.vmem [#allocation7], %s2963_s30  ;;  %s470_s1 = sshll.u32 %s469_s20, 4  ;;  %s471_s1 = int_to_ptr.hbm [resolvable:$true] %s470_s1 }
  0x47   : > { %s472_s9 = sshll.u32 %s462_s11, 4  ;;  %484 = sbr.rel (%p2911_p8) target bundleno = 1166 (0x48e), region = 64  ;;  %s473_s9 = int_to_ptr.vmem [resolvable:$true] %s472_s9 }
  0x48   : > { %2196 = dma.hbm_to_vmem [thread:$0]  (!%p2973_p2), %s471_s1, 256, %s473_s9, %s2986_s10, %s3882_s28, %s3882_s28, %s3881_s26  }
  0x49   : > { %s3036_s5 = sand.u32 (!%p2911_p8), 1, %s2748_s18  }
  0x4a   : > { %s3039_s21 = sshll.u32 (!%p2911_p8), %s3036_s5, 4  ;;  %s487_s30 = scalar_lea.sflag (!%p2911_p8), [#allocation3], %s3036_s5 }
  0x4b   : > { %s490_s7 = scalar_lea.vmem (!%p2911_p8), [#allocation2], %s3039_s21 }
  0x4c   : > { %2723 = dma.done.wait (%p2898_p4), %s487_s30, 256  }
  0x4d   : > { %2725 = vsyncadd (%p2898_p4), %s487_s30, 4294967040  ;;  %s496_s9 = sand.u32 1, %s2889_s25   ;;  %s500_s17 = scalar_lea.vmem [#allocation5], %s3039_s21 }
  0x4e   : > { %s497_s13 = scalar_lea.sflag [#allocation6], %s496_s9 }
  0x4f   : > { %2727 = dma.done.wait (%p2898_p4), %s497_s13, 512  }
  0x50   : > { %2729 = vsyncadd (%p2898_p4), %s497_s13, 4294966784  ;;  %s510_s10 = scalar_lea.vmem [#allocation7], %s3039_s21 }
  0x51   : > { %2731 = dma.done.wait (%p67_p1), [#allocation9], 2048  }
  0x52   : > { %2733 = vsyncadd (%p67_p1), [#allocation9], 4294965248 }
  0x53   : > { %2735 = dma.done.wait (%p67_p1), [#allocation12], 2048  }
  0x54   : > { %2737 = vsyncadd (%p67_p1), [#allocation12], 4294965248  ;;  %v593_v0 = vld [vmem:[#allocation8 + $0x38] sm:$0xff]  ;;  %v592_v2 = vld [vmem:[#allocation8 + $0x30] sm:$0xff]  ;;  %vm598_vm0 = vcmask 523264   ;;  %s2780_s26 = smov 96  }
  0x55   : > { %v639_v1 = vld [vmem:[#allocation10 + $0x38] sm:$0xff]  ;;  %613 = vmatpush.msra.mxu0 %v593_v0  ;;  %v638_v3 = vld [vmem:[#allocation10 + $0x30] sm:$0xff]  ;;  %v591_v4 = vld [vmem:[#allocation8 + $0x28] sm:$0xff]  ;;  %s2781_s28 = smov 112   ;;  %vm730_vm1 = vcmask 130048   ;;  %s2782_s3 = smov 80  }
  0x56   : > { %658 = vmatpush.msra.mxu1 %v639_v1  ;;  %v637_v5 = vld [vmem:[#allocation10 + $0x28] sm:$0xff]  ;;  %v590_v6 = vld [vmem:[#allocation8 + $0x20] sm:$0xff]  ;;  %v589_v8 = vld [vmem:[#allocation8 + $0x18] sm:$0xff]  ;;  %s3886_s16 = sld [smem:[#allocation32_spill]]  ;;  %s2783_s14 = smov 16   ;;  %vm1791_vm2 = vcmask 261120  }
  0x57   : > { %614 = vmatpush.msra.mxu0 %v592_v2  ;;  %v636_v7 = vld [vmem:[#allocation10 + $0x20] sm:$0xff]  ;;  %v635_v9 = vld [vmem:[#allocation10 + $0x18] sm:$0xff]  ;;  %v588_v10 = vld [vmem:[#allocation8 + $0x10] sm:$0xff]  ;;  %s2784_s20 = smov 32   ;;  %s2785_s11 = smov 48   ;;  %vm1794_vm3 = vcmask 392192  }
  0x58   : > { %659 = vmatpush.msra.mxu1 %v638_v3  ;;  %v634_v11 = vld [vmem:[#allocation10 + $0x10] sm:$0xff]  ;;  %v587_v12 = vld [vmem:[#allocation8 + $0x8] sm:$0xff]  ;;  %v586_v14 = vld [vmem:[#allocation8] sm:$0xff]  ;;  %s3901_s1 = sld [smem:[#allocation21_spill]] }
  0x59   : > { %615 = vmatpush.msra.mxu0 %v591_v4  ;;  %v633_v13 = vld [vmem:[#allocation10 + $0x8] sm:$0xff]  ;;  %v632_v15 = vld [vmem:[#allocation10] sm:$0xff]  ;;  %v682_v25 = vld [vmem:[#allocation11 + $0x38] sm:$0xff]  ;;  %s3902_s30 = sld [smem:[#allocation22_spill]] }
  0x5a   : > { %660 = vmatpush.msra.mxu1 %v637_v5  ;;  %v584_v16 = vld [vmem:[%s490_s7] sm:$0xff]  ;;  %v585_v18 = vld [vmem:[%s490_s7 + $0x8] sm:$0xff]  ;;  %701 = vmatpush.msra.mxu2 %v682_v25 }
  0x5b   : > { %616 = vmatpush.msra.mxu0 %v590_v6  ;;  %v630_v17 = vld [vmem:[%s500_s17] sm:$0xff]  ;;  %v631_v19 = vld [vmem:[%s500_s17 + $0x8] sm:$0xff] }
  0x5c   : > { %661 = vmatpush.msra.mxu1 %v636_v7  ;;  %v2304_v20 = vld [vmem:[%s3834_s4] ss:$0 sm:$0xff]  ;;  %v681_v33 = vld [vmem:[#allocation11 + $0x30] sm:$0xff]  ;;  %v680_v34 = vld [vmem:[#allocation11 + $0x28] sm:$0xff] }
  0x5d   : > { %617 = vmatpush.msra.mxu0 %v589_v8  ;;  %v2305_v26 = vld [vmem:[%s3836_s6] ss:$0 sm:$0xff]  ;;  %702 = vmatpush.msra.mxu2 %v681_v33  ;;  %v678_v36 = vld [vmem:[#allocation11 + $0x18] sm:$0xff]  ;;  %v677_v37 = vld [vmem:[#allocation11 + $0x10] sm:$0xff] }
  0x5e   : > { %662 = vmatpush.msra.mxu1 %v635_v9  ;;  %v679_v35 = vld [vmem:[#allocation11 + $0x20] sm:$0xff]  ;;  %v676_v38 = vld [vmem:[#allocation11 + $0x8] sm:$0xff]  ;;  %s2145_s7 = sshll.u32 %s3901_s1, 1 }
  0x5f   : > { %618 = vmatpush.msra.mxu0 %v588_v10  ;;  %703 = vmatpush.msra.mxu2 %v680_v34  ;;  %v675_v39 = vld [vmem:[#allocation11] sm:$0xff]  ;;  %v674_v41 = vld [vmem:[%s510_s10 + $0x8] sm:$0xff]  ;;  %s2146_s9 = sshll.u32 %s3902_s30, 3 }
  0x60   : > { %663 = vmatpush.msra.mxu1 %v634_v11  ;;  %v673_v40 = vld [vmem:[%s510_s10] sm:$0xff]  ;;  %s3903_s10 = sld [smem:[#allocation34_spill]]  ;;  %s1852_s25 = sadd.s32 %s2146_s9, %s2145_s7 }
  0x61   : > { %619 = vmatpush.msra.mxu0 %v587_v12  ;;  %704 = vmatpush.msra.mxu2 %v679_v35  ;;  %v2306_v59 = vld [vmem:[%s3886_s16] ss:$0 sm:$0xff]  ;;  %s2147_s27 = sshll.u32 %s1852_s25, 3 }
  0x62   : > { %664 = vmatpush.msra.mxu1 %v633_v13 }
  0x63   : > { %620 = vmatpush.msra.mxu0 %v586_v14  ;;  %705 = vmatpush.msra.mxu2 %v678_v36 }
  0x64   : > { %665 = vmatpush.msra.mxu1 %v632_v15  ;;  %2064 = vmatmul.msk.f32.vlgmr.msra.gmra.mxu0 %vm598_vm0, %v584_v16 }
  0x65   : > { %2066 = vmatmul.msk.f32.vlgmr.msra.gmra.mxu1 %vm598_vm0, %v630_v17  ;;  %706 = vmatpush.msra.mxu2 %v677_v37 }
  0x67   : > { %707 = vmatpush.msra.mxu2 %v676_v38 }
  0x69   : > { %708 = vmatpush.msra.mxu2 %v675_v39 }
  0x6a   : > { %2068 = vmatmul.msk.f32.vlgmr.msra.gmra.mxu2 %vm598_vm0, %v673_v40 }
  0x6c   : > { %2065 = vmatmul.msk.f32.gmra.mxu0 %vm598_vm0, %v585_v18 }
  0x6d   : > { %2067 = vmatmul.msk.f32.gmra.mxu1 %vm598_vm0, %v631_v19 }
  0x72   : > { %2069 = vmatmul.msk.f32.gmra.mxu2 %vm598_vm0, %v674_v41 }
  0xe1   : > { %v622_v21 = vpop.f32.mrf.mxu0 }
  0xe2   : > { %v667_v22 = vpop.f32.mrf.mxu1  ;;  %v623_v23 = vadd.f32 %v2304_v20, %v622_v21 }
  0xe3   : > { %v668_v32 = vadd.f32 %v2305_v26, %v667_v22 }
  0xe4   : > { %v3077_v24 = vmul.f32 0.25, %v623_v23 }
  0xe6   : > { %722 = vrot.lane.b32.xlu2 %v3077_v24, %s2780_s26  ;;  %718 = vrot.lane.b32.xlu1 %v3077_v24, %s2781_s28 }
  0xe9   : > { %v625_v27 = vpop.f32.mrf.mxu0 }
  0xea   : > { %v670_v28 = vpop.f32.mrf.mxu1  ;;  %v626_v29 = vadd.f32 %v2304_v20, %v625_v27 }
  0xeb   : > { %v671_v30 = vadd.f32 %v2305_v26, %v670_v28 }
  0xec   : > { %v3086_v31 = vmul.f32 0.25, %v626_v29 }
  0xed   : > { %981 = vrot.lane.b32.xlu0 %v671_v30, %s2781_s28  ;;  %2070 = vmatpush.xpose.msk.msra.mxu3 %vm730_vm1, %v671_v30  ;;  %v710_v58 = vpop.f32.mrf.mxu2 }
  0xee   : > { %724 = vrot.lane.b32.xlu2 %v3086_v31, %s2780_s26  ;;  %720 = vrot.lane.b32.xlu1 %v3086_v31, %s2781_s28  ;;  %v711_v60 = vadd.f32 %v2306_v59, %v710_v58 }
  0xf1   : > { %2071 = vmatpush.xpose.msk.msra.mxu3 %vm730_vm1, %v668_v32 }
  0xf4   : > { %2072 = vmatmul.msk.f32.vlgmr.msra.gmra.mxu3 %vm730_vm1, %v3077_v24 }
  0xf5   : > { %979 = vrot.lane.b32.xlu0 %v668_v32, %s2781_s28  ;;  %v713_v61 = vpop.f32.mrf.mxu2 }
  0xf6   : > { %1239 = vrot.lane.b32.xlu2 %v671_v30, %s2780_s26  ;;  %728 = vrot.lane.b32.xlu1 %v3086_v31, %s2782_s3  ;;  %v714_v62 = vadd.f32 %v2306_v59, %v713_v61 }
  0xf8   : > { %944 = vmatpush.msrb.mxu0 %v714_v62  ;;  %v3155_v63 = vpack.i.bf16 %v711_v60, %v714_v62 }
  0xfa   : > { %945 = vmatpush.msrb.mxu0 %v711_v60 }
  0xfc   : > { %2073 = vmatmul.msk.f32.gmra.mxu3 %vm730_vm1, %v3086_v31 }
  0xfd   : > { %726 = vrot.lane.b32.xlu0 %v3077_v24, %s2782_s3 }
  0xfe   : > { %1493 = vrot.lane.b32.xlu2 %v668_v32, %s2782_s3  ;;  %1495 = vrot.lane.b32.xlu1 %v671_v30, %s2782_s3 }
 0x105   : > { %1237 = vrot.lane.b32.xlu0 %v668_v32, %s2780_s26 }
 0x140   : > { %v723_v42 = vpop.permute.xlu2 %722 }
 0x148   : > { %v725_v43 = vpop.permute.xlu2 %724 }
 0x150   : > { %v1240_v44 = vpop.permute.xlu2 %1239 }
 0x151   : > { %2106 = vmatpush.xpose.msk.msrb.mxu3 %vm730_vm1, %v1240_v44 }
 0x158   : > { %v719_v45 = vpop.permute.xlu1 %718  ;;  %v1494_v52 = vpop.permute.xlu2 %1493 }
 0x159   : > { %2074 = vmatmul.msk.f32.gmra.mxu3 %vm730_vm1, %v719_v45 }
 0x15f   : > { %v982_v46 = vpop.permute.xlu0 %981 }
 0x160   : > { %2088 = vmatpush.xpose.msk.msrb.mxu1 %vm730_vm1, %v982_v46  ;;  %v721_v47 = vpop.permute.xlu1 %720 }
 0x161   : > { %2075 = vmatmul.msk.f32.gmra.mxu3 %vm730_vm1, %v721_v47 }
 0x167   : > { %v980_v48 = vpop.permute.xlu0 %979 }
 0x168   : > { %2089 = vmatpush.xpose.msk.msrb.mxu1 %vm730_vm1, %v980_v48  ;;  %v729_v49 = vpop.permute.xlu1 %728 }
 0x169   : > { %2076 = vmatmul.msk.f32.gmra.mxu3 %vm730_vm1, %v723_v42 }
 0x16b   : > { %2090 = vmatmul.msk.f32.vlgmr.msrb.gmra.mxu1 %vm730_vm1, %v3077_v24 }
 0x16f   : > { %v727_v50 = vpop.permute.xlu0 %726 }
 0x170   : > { %v1496_v51 = vpop.permute.xlu1 %1495 }
 0x171   : > { %2077 = vmatmul.msk.f32.gmra.mxu3 %vm730_vm1, %v725_v43  ;;  %2124 = vmatpush.xpose.msk.msra.mxu1 %vm730_vm1, %v1496_v51 }
 0x173   : > { %2091 = vmatmul.msk.f32.gmra.mxu1 %vm730_vm1, %v3086_v31 }
 0x175   : > { %2125 = vmatpush.xpose.msk.msra.mxu1 %vm730_vm1, %v1494_v52 }
 0x177   : > { %v1238_v53 = vpop.permute.xlu0 %1237  ;;  %v770_v54 = vpop.f32.mrf.mxu3 }
 0x178   : > { %2107 = vmatpush.xpose.msk.msrb.mxu3 %vm730_vm1, %v1238_v53  ;;  %v794_v55 = vsel %vm730_vm1, %v770_v54, -inf }
 0x179   : > { %795 = vmax.xlane.f32.xlu0 %v794_v55  ;;  %2078 = vmatmul.msk.f32.gmra.mxu3 %vm730_vm1, %v727_v50 }
 0x17b   : > { %2092 = vmatmul.msk.f32.gmra.mxu1 %vm730_vm1, %v719_v45 }
 0x17f   : > { %v773_v56 = vpop.f32.mrf.mxu3 }
 0x180   : > { %v797_v57 = vsel %vm730_vm1, %v773_v56, -inf }
 0x181   : > { %798 = vmax.xlane.f32.xlu2 %v797_v57  ;;  %2079 = vmatmul.msk.f32.gmra.mxu3 %vm730_vm1, %v729_v49 }
 0x183   : > { %2093 = vmatmul.msk.f32.gmra.mxu1 %vm730_vm1, %v721_v47 }
 0x189   : > { %2108 = vmatmul.msk.f32.vlgmr.msrb.gmra.mxu3 %vm730_vm1, %v3077_v24 }
 0x18b   : > { %2094 = vmatmul.msk.f32.gmra.mxu1 %vm730_vm1, %v723_v42 }
 0x18d   : > { %2290 = vrot.lane.b32.xlu0 %v3155_v63, %s2781_s28  ;;  %s579_s28 = scalar_lea.vmem [#allocation14], %s3039_s21 }
 0x18e   : > { %s1855_s29 = sshll.u32 %s579_s28, 4  ;;  %s1856_s29 = int_to_ptr.vmem [resolvable:$true] %s1855_s29 }
 0x191   : > { %2109 = vmatmul.msk.f32.gmra.mxu3 %vm730_vm1, %v3086_v31 }
 0x193   : > { %2095 = vmatmul.msk.f32.gmra.mxu1 %vm730_vm1, %v725_v43 }
 0x199   : > { %2110 = vmatmul.msk.f32.gmra.mxu3 %vm730_vm1, %v719_v45 }
 0x19b   : > { %2096 = vmatmul.msk.f32.gmra.mxu1 %vm730_vm1, %v727_v50 }
 0x1a1   : > { %2111 = vmatmul.msk.f32.gmra.mxu3 %vm730_vm1, %v721_v47 }
 0x1a3   : > { %2097 = vmatmul.msk.f32.gmra.mxu1 %vm730_vm1, %v729_v49 }
 0x1a9   : > { %2112 = vmatmul.msk.f32.gmra.mxu3 %vm730_vm1, %v723_v42 }
 0x1ab   : > { %2126 = vmatmul.msk.f32.vlgmr.msra.gmra.mxu1 %vm730_vm1, %v3077_v24 }
 0x1b1   : > { %2113 = vmatmul.msk.f32.gmra.mxu3 %vm730_vm1, %v725_v43 }
 0x1b3   : > { %2127 = vmatmul.msk.f32.gmra.mxu1 %vm730_vm1, %v3086_v31 }
 0x1b9   : > { %2114 = vmatmul.msk.f32.gmra.mxu3 %vm730_vm1, %v727_v50 }
 0x1bb   : > { %2128 = vmatmul.msk.f32.gmra.mxu1 %vm730_vm1, %v719_v45 }
 0x1c1   : > { %2115 = vmatmul.msk.f32.gmra.mxu3 %vm730_vm1, %v729_v49 }
 0x1c3   : > { %2129 = vmatmul.msk.f32.gmra.mxu1 %vm730_vm1, %v721_v47 }
 0x1cb   : > { %2130 = vmatmul.msk.f32.gmra.mxu1 %vm730_vm1, %v723_v42 }
 0x1d3   : > { %2131 = vmatmul.msk.f32.gmra.mxu1 %vm730_vm1, %v725_v43 }
 0x1db   : > { %2132 = vmatmul.msk.f32.gmra.mxu1 %vm730_vm1, %v727_v50 }
 0x1dc   : > { %v3164_v0 = vpop.f32.mrf.mxu3 }
 0x1dd   : > { %v800_v1 = vsel %vm730_vm1, %v3164_v0, -inf }
 0x1de   : > { %801 = vmax.xlane.f32.xlu1 %v800_v1 }
 0x1e3   : > { %2133 = vmatmul.msk.f32.gmra.mxu1 %vm730_vm1, %v729_v49 }
 0x1e4   : > { %v3169_v2 = vpop.f32.mrf.mxu3 }
 0x1e5   : > { %v803_v9 = vsel %vm730_vm1, %v3169_v2, -inf }
 0x1e8   : > { %v3171_v3 = vpop.f32.mrf.mxu1 }
 0x1e9   : > { %v1028_v4 = vsel %vm730_vm1, %v3171_v3, -inf }
 0x1ea   : > { %1029 = vmax.xlane.f32.xlu1 %v1028_v4 }
 0x1ec   : > { %v3175_v5 = vpop.xlane.xlu0 %795  ;;  %v3178_v7 = vpop.f32.mrf.mxu3 }
 0x1ed   : > { %v842_v6 = vsub.f32 %v770_v54, %v3175_v5  ;;  %v806_v19 = vsel %vm730_vm1, %v3178_v7, -inf }
 0x1ef   : > { %v850_v8 = vmul.f32 1.442695, %v842_v6 }
 0x1f0   : > { %v3182_v10 = vpop.f32.mrf.mxu1 }
 0x1f1   : > { %2308 = vpow2.f32 %v850_v8  ;;  %v1031_v11 = vsel %vm730_vm1, %v3182_v10, -inf }
 0x1f2   : > { %1032 = vmax.xlane.f32.xlu2 %v1031_v11  ;;  %804 = vmax.xlane.f32.xlu1 %v803_v9 }
 0x1f4   : > { %v3186_v12 = vpop.xlane.xlu2 %798  ;;  %v3189_v14 = vpop.f32.mrf.mxu3 }
 0x1f5   : > { %v843_v13 = vsub.f32 %v773_v56, %v3186_v12  ;;  %v809_v23 = vsel %vm730_vm1, %v3189_v14, -inf }
 0x1f7   : > { %v3191_v15 = vpop.eup %2308  ;;  %v852_v16 = vmul.f32 1.442695, %v843_v13 }
 0x1f8   : > { %2080 = vmatmul.msk.f32.vlgmr.msrb.gmra.mxu0 %vm730_vm1, %v3191_v15  ;;  %v3195_v17 = vpop.f32.mrf.mxu1 }
 0x1f9   : > { %2310 = vpow2.f32 %v852_v16  ;;  %v1034_v18 = vsel %vm730_vm1, %v3195_v17, -inf }
 0x1fa   : > { %1035 = vmax.xlane.f32.xlu2 %v1034_v18  ;;  %807 = vmax.xlane.f32.xlu1 %v806_v19  ;;  %v818_v18 = vsub.f32 -inf, %v3175_v5 }
 0x1fc   : > { %v3201_v20 = vpop.f32.mrf.mxu3 }
 0x1fd   : > { %v812_v31 = vsel %vm730_vm1, %v3201_v20, -inf }
 0x1ff   : > { %v3203_v21 = vpop.eup %2310  ;;  %v2291_v51 = vpop.permute.xlu0 %2290 }
 0x200   : > { %2081 = vmatmul.msk.f32.gmra.mxu0 %vm730_vm1, %v3203_v21  ;;  %v3207_v22 = vpop.f32.mrf.mxu1  ;;  %v2292_v54 = vunpack.i.l.bf16 %v2291_v51  ;;  %v2293_v55 = vunpack.i.h.bf16 %v2291_v51 }
 0x201   : > { %v1037_v27 = vsel %vm730_vm1, %v3207_v22, -inf }
 0x202   : > { %810 = vmax.xlane.f32.xlu2 %v809_v23  ;;  %1202 = vmatpush.msrb.mxu2 %v2292_v54 }
 0x204   : > { %v3211_v24 = vpop.f32.mrf.mxu3  ;;  %1203 = vmatpush.msrb.mxu2 %v2293_v55 }
 0x205   : > { %v815_v35 = vsel %vm730_vm1, %v3211_v24, -inf }
 0x208   : > { %v3213_v25 = vpop.f32.mrf.mxu1 }
 0x209   : > { %v1040_v26 = vsel %vm730_vm1, %v3213_v25, -inf }
 0x20a   : > { %1041 = vmax.xlane.f32.xlu0 %v1040_v26  ;;  %1038 = vmax.xlane.f32.xlu2 %v1037_v27 }
 0x20c   : > { %v3219_v28 = vpop.f32.mrf.mxu3 }
 0x20d   : > { %v1286_v39 = vsel %vm730_vm1, %v3219_v28, -inf }
 0x210   : > { %v3221_v29 = vpop.f32.mrf.mxu1 }
 0x211   : > { %v1043_v30 = vsel %vm730_vm1, %v3221_v29, -inf }
 0x212   : > { %1044 = vmax.xlane.f32.xlu1 %v1043_v30  ;;  %813 = vmax.xlane.f32.xlu2 %v812_v31 }
 0x214   : > { %v3227_v32 = vpop.f32.mrf.mxu3 }
 0x215   : > { %v1289_v43 = vsel %vm730_vm1, %v3227_v32, -inf }
 0x218   : > { %v3229_v33 = vpop.f32.mrf.mxu1 }
 0x219   : > { %v1046_v34 = vsel %vm730_vm1, %v3229_v33, -inf }
 0x21a   : > { %1047 = vmax.xlane.f32.xlu1 %v1046_v34  ;;  %816 = vmax.xlane.f32.xlu2 %v815_v35 }
 0x21c   : > { %v3235_v36 = vpop.f32.mrf.mxu3 }
 0x21d   : > { %v1292_v42 = vsel %vm730_vm1, %v3235_v36, -inf }
 0x21e   : > { %2295 = vrot.lane.b32.xlu0 %v3155_v63, %s2782_s3  ;;  %s3905_s3 = sld [smem:[#allocation35_spill]] }
 0x220   : > { %v3239_v37 = vpop.f32.mrf.mxu1 }
 0x221   : > { %v1049_v38 = vsel %vm730_vm1, %v3239_v37, -inf }
 0x222   : > { %1050 = vmax.xlane.f32.xlu1 %v1049_v38  ;;  %1287 = vmax.xlane.f32.xlu2 %v1286_v39 }
 0x224   : > { %v3245_v40 = vpop.f32.mrf.mxu3  ;;  %s1854_s8 = scalar_lea.hbm %s3905_s3, %s2147_s27  ;;  %s2682_s30 = scalar_lea.hbm %s3905_s3, 128 }
 0x225   : > { %v1295_v48 = vsel %vm730_vm1, %v3245_v40, -inf  ;;  %s1857_s16 = sshll.u32 %s1854_s8, 4  ;;  %s1858_s16 = int_to_ptr.hbm [resolvable:$true] %s1857_s16 }
 0x228   : > { %v3247_v41 = vpop.f32.mrf.mxu1 }
 0x229   : > { %v1542_v46 = vsel %vm730_vm1, %v3247_v41, -inf }
 0x22a   : > { %1293 = vmax.xlane.f32.xlu1 %v1292_v42  ;;  %1290 = vmax.xlane.f32.xlu2 %v1289_v43 }
 0x22c   : > { %v3253_v44 = vpop.f32.mrf.mxu3 }
 0x22d   : > { %v1298_v42 = vsel %vm730_vm1, %v3253_v44, -inf }
 0x230   : > { %v3255_v45 = vpop.f32.mrf.mxu1 }
 0x231   : > { %v1545_v50 = vsel %vm730_vm1, %v3255_v45, -inf }
 0x232   : > { %1543 = vmax.xlane.f32.xlu1 %v1542_v46 }
 0x234   : > { %v3259_v47 = vpop.f32.mrf.mxu3 }
 0x235   : > { %v1301_v60 = vsel %vm730_vm1, %v3259_v47, -inf }
 0x238   : > { %v3263_v49 = vpop.f32.mrf.mxu1 }
 0x239   : > { %v1548_v57 = vsel %vm730_vm1, %v3263_v49, -inf }
 0x23a   : > { %1296 = vmax.xlane.f32.xlu1 %v1295_v48 }
 0x23c   : > { %v3267_v52 = vpop.f32.mrf.mxu3 }
 0x23d   : > { %v1304_v4 = vsel %vm730_vm1, %v3267_v52, -inf }
 0x240   : > { %v3271_v53 = vpop.f32.mrf.mxu1 }
 0x241   : > { %v1551_v56 = vsel %vm730_vm1, %v3271_v53, -inf }
 0x242   : > { %1546 = vmax.xlane.f32.xlu1 %v1545_v50  ;;  %2300 = vrot.lane.b32.xlu2 %v3155_v63, %s2780_s26 }
 0x244   : > { %v3277_v58 = vpop.f32.mrf.mxu3 }
 0x245   : > { %v1307_v59 = vsel %vm730_vm1, %v3277_v58, -inf }
 0x248   : > { %1552 = vmax.xlane.f32.xlu0 %v1551_v56  ;;  %v3287_v1 = vpop.f32.mrf.mxu1 }
 0x249   : > { %v1554_v11 = vsel %vm730_vm1, %v3287_v1, -inf }
 0x24a   : > { %1549 = vmax.xlane.f32.xlu1 %v1548_v57 }
 0x250   : > { %1308 = vmax.xlane.f32.xlu0 %v1307_v59  ;;  %v3302_v13 = vpop.f32.mrf.mxu1 }
 0x251   : > { %v3283_v61 = vpop.xlane.xlu1 %801  ;;  %v1557_v35 = vsel %vm730_vm1, %v3302_v13, -inf }
 0x252   : > { %1302 = vmax.xlane.f32.xlu1 %v1301_v60  ;;  %v844_v62 = vsub.f32 %v3164_v0, %v3283_v61 }
 0x254   : > { %v854_v63 = vmul.f32 1.442695, %v844_v62 }
 0x256   : > { %2312 = vpow2.f32 %v854_v63 }
 0x25a   : > { %1305 = vmax.xlane.f32.xlu1 %v1304_v4 }
 0x25c   : > { %v3291_v6 = vpop.eup %2312 }
 0x25d   : > { %v1030_v8 = vpop.xlane.xlu1 %1029  ;;  %2082 = vmatmul.msk.f32.gmra.mxu0 %vm730_vm1, %v3291_v6 }
 0x25e   : > { %v3294_v9 = vmax.f32 %v3175_v5, %v1030_v8 }
 0x260   : > { %v1084_v0 = vsub.f32 %v3171_v3, %v3294_v9  ;;  %v826_v3 = vmul.f32 1.442695, %v818_v18  ;;  %v1060_v34 = vsub.f32 %v3175_v5, %v3294_v9 }
 0x262   : > { %v1092_v16 = vmul.f32 1.442695, %v1084_v0  ;;  %1555 = vmax.xlane.f32.xlu1 %v1554_v11  ;;  %v1068_v5 = vmul.f32 1.442695, %v1060_v34 }
 0x264   : > { %2314 = vpow2.f32 %v1092_v16 }
 0x265   : > { %v1033_v19 = vpop.xlane.xlu2 %1032  ;;  %v3305_v23 = vpop.xlane.xlu1 %804 }
 0x266   : > { %v3308_v26 = vmax.f32 %v3186_v12, %v1033_v19  ;;  %v845_v27 = vsub.f32 %v3169_v2, %v3305_v23 }
 0x268   : > { %v1085_v30 = vsub.f32 %v3182_v10, %v3308_v26  ;;  %v856_v31 = vmul.f32 1.442695, %v845_v27  ;;  %v3322_v10 = vpop.f32.mrf.mxu1 }
 0x269   : > { %v1560_v59 = vsel %vm730_vm1, %v3322_v10, -inf }
 0x26a   : > { %v2315_v38 = vpop.eup %2314  ;;  %v1094_v39 = vmul.f32 1.442695, %v1085_v30  ;;  %2316 = vpow2.f32 %v856_v31  ;;  %1558 = vmax.xlane.f32.xlu1 %v1557_v35 }
 0x26b   : > { %2098 = vmatmul.msk.f32.vlgmr.msrb.gmra.mxu2 %vm730_vm1, %v2315_v38  ;;  %1299 = vmax.xlane.f32.xlu2 %v1298_v42  ;;  %v1116_v2 = vsel %vm730_vm1, %v2315_v38, 0.0  ;;  %2318 = vpow2.f32 %v826_v3 }
 0x26c   : > { %2320 = vpow2.f32 %v1094_v39  ;;  %1117 = vadd.xlane.f32.xlu0 %v1116_v2 }
 0x26d   : > { %v1036_v43 = vpop.xlane.xlu2 %1035  ;;  %v3324_v46 = vpop.xlane.xlu1 %807  ;;  %2322 = vpow2.f32 %v1068_v5 }
 0x26e   : > { %v3327_v48 = vmax.f32 %v3283_v61, %v1036_v43  ;;  %v846_v50 = vsub.f32 %v3178_v7, %v3324_v46  ;;  %v874_v7 = vsel %vm730_vm1, %v3191_v15, 0.0 }
 0x270   : > { %v2317_v51 = vpop.eup %2316  ;;  %v1062_v54 = vsub.f32 %v3283_v61, %v3327_v48  ;;  %v1086_v55 = vsub.f32 %v3195_v17, %v3327_v48  ;;  %v858_v56 = vmul.f32 1.442695, %v846_v50  ;;  %v3348_v8 = vpop.f32.mrf.mxu1 }
 0x271   : > { %v2319_v57 = vpop.eup %2318  ;;  %2083 = vmatmul.msk.f32.gmra.mxu0 %vm730_vm1, %v2317_v51  ;;  %v1563_v27 = vsel %vm730_vm1, %v3348_v8, -inf  ;;  %v883_v5 = vsel %vm730_vm1, %v2317_v51, 0.0 }
 0x272   : > { %v3338_v60 = vpop.eup %2320  ;;  %v1096_v62 = vmul.f32 1.442695, %v1086_v55  ;;  %2324 = vpow2.f32 %v858_v56  ;;  %1561 = vmax.xlane.f32.xlu1 %v1560_v59  ;;  %v3344_v17 = vmul.f32 0.0, %v2319_v57 }
 0x273   : > { %2099 = vmatmul.msk.f32.gmra.mxu2 %vm730_vm1, %v3338_v60  ;;  %875 = vadd.xlane.f32.xlu2 %v874_v7  ;;  %v3353_v16 = vpop.eup %2322 }
 0x274   : > { %2326 = vpow2.f32 %v1096_v62 }
 0x275   : > { %v947_v63 = vpop.f32.mrf.mxu0  ;;  %v3346_v4 = vpop.xlane.xlu2 %810 }
 0x276   : > { %v971_v0 = vadd.f32 %v947_v63, %v3344_v17  ;;  %v847_v11 = vsub.f32 %v3189_v14, %v3346_v4  ;;  %v880_v14 = vsel %vm730_vm1, %v3291_v6, 0.0  ;;  %v877_v6 = vsel %vm730_vm1, %v3203_v21, 0.0 }
 0x278   : > { %v2325_v15 = vpop.eup %2324  ;;  %v860_v18 = vmul.f32 1.442695, %v847_v11  ;;  %v3356_v19 = vmul.f32 %v3353_v16, %v971_v0 }
 0x279   : > { %2084 = vmatmul.msk.f32.gmra.mxu0 %vm730_vm1, %v2325_v15  ;;  %v886_v3 = vsel %vm730_vm1, %v2325_v15, 0.0 }
 0x27a   : > { %v2327_v30 = vpop.eup %2326  ;;  %2328 = vpow2.f32 %v860_v18  ;;  %1564 = vmax.xlane.f32.xlu1 %v1563_v27  ;;  %887 = vadd.xlane.f32.xlu0 %v886_v3 }
 0x27b   : > { %2100 = vmatmul.msk.f32.gmra.mxu2 %vm730_vm1, %v2327_v30  ;;  %881 = vadd.xlane.f32.xlu2 %v880_v14  ;;  %v1122_v7 = vsel %vm730_vm1, %v2327_v30, 0.0 }
 0x27d   : > { %v1042_v31 = vpop.xlane.xlu0 %1041  ;;  %v1039_v34 = vpop.xlane.xlu2 %1038 }
 0x27e   : > { %v3366_v35 = vmax.f32 %v3305_v23, %v1039_v34  ;;  %v3369_v39 = vmax.f32 %v3324_v46, %v1042_v31 }
 0x280   : > { %v2329_v38 = vpop.eup %2328  ;;  %v1063_v42 = vsub.f32 %v3305_v23, %v3366_v35  ;;  %v1087_v2 = vsub.f32 %v3207_v22, %v3366_v35  ;;  %v1088_v50 = vsub.f32 %v3213_v25, %v3369_v39 }
 0x281   : > { %2085 = vmatmul.msk.f32.gmra.mxu0 %vm730_vm1, %v2329_v38  ;;  %v889_v62 = vsel %vm730_vm1, %v2329_v38, 0.0 }
 0x282   : > { %878 = vadd.xlane.f32.xlu1 %v877_v6  ;;  %v1098_v43 = vmul.f32 1.442695, %v1087_v2  ;;  %v1100_v59 = vmul.f32 1.442695, %v1088_v50 }
 0x283   : > { %884 = vadd.xlane.f32.xlu2 %v883_v5 }
 0x284   : > { %2330 = vpow2.f32 %v1098_v43 }
 0x285   : > { %v1045_v55 = vpop.xlane.xlu1 %1044  ;;  %v3384_v57 = vpop.xlane.xlu2 %813 }
 0x286   : > { %v3382_v56 = vmax.f32 %v3346_v4, %v1045_v55  ;;  %v848_v22 = vsub.f32 %v3201_v20, %v3384_v57 }
 0x288   : > { %v1065_v21 = vsub.f32 %v3346_v4, %v3382_v56  ;;  %v862_v51 = vmul.f32 1.442695, %v848_v22  ;;  %v1089_v25 = vsub.f32 %v3221_v29, %v3382_v56 }
 0x28a   : > { %890 = vadd.xlane.f32.xlu1 %v889_v62  ;;  %v2331_v63 = vpop.eup %2330  ;;  %2332 = vpow2.f32 %v862_v51  ;;  %v1102_v0 = vmul.f32 1.442695, %v1089_v25 }
 0x28b   : > { %1123 = vadd.xlane.f32.xlu2 %v1122_v7  ;;  %2101 = vmatmul.msk.f32.gmra.mxu2 %vm730_vm1, %v2331_v63  ;;  %2334 = vpow2.f32 %v1100_v59 }
 0x28c   : > { %2336 = vpow2.f32 %v1102_v0 }
 0x28d   : > { %v1048_v20 = vpop.xlane.xlu1 %1047  ;;  %v3398_v15 = vpop.xlane.xlu2 %816 }
 0x28e   : > { %v3396_v11 = vmax.f32 %v3384_v57, %v1048_v20  ;;  %v849_v18 = vsub.f32 %v3211_v24, %v3398_v15  ;;  %v1125_v24 = vsel %vm730_vm1, %v2331_v63, 0.0 }
 0x290   : > { %v2296_v27 = vpop.permute.xlu0 %2295  ;;  %v2333_v3 = vpop.eup %2332  ;;  %v864_v30 = vmul.f32 1.442695, %v849_v18  ;;  %v1090_v31 = vsub.f32 %v3229_v33, %v3396_v11 }
 0x291   : > { %v2297_v14 = vunpack.i.l.bf16 %v2296_v27  ;;  %2086 = vmatmul.msk.f32.gmra.mxu0 %vm730_vm1, %v2333_v3  ;;  %v892_v34 = vsel %vm730_vm1, %v2333_v3, 0.0  ;;  %v2335_v38 = vpop.eup %2334  ;;  %v2298_v2 = vunpack.i.h.bf16 %v2296_v27 }
 0x292   : > { %2338 = vpow2.f32 %v864_v30  ;;  %893 = vadd.xlane.f32.xlu1 %v892_v34  ;;  %v1104_v5 = vmul.f32 1.442695, %v1090_v31  ;;  %v2337_v50 = vpop.eup %2336 }
 0x293   : > { %1714 = vmatpush.msra.mxu2 %v2297_v14  ;;  %1126 = vadd.xlane.f32.xlu2 %v1125_v24  ;;  %v1131_v25 = vsel %vm730_vm1, %v2337_v50, 0.0 }
 0x294   : > { %2102 = vmatmul.msk.f32.gmra.mxu2 %vm730_vm1, %v2335_v38  ;;  %2340 = vpow2.f32 %v1104_v5 }
 0x295   : > { %1715 = vmatpush.msra.mxu2 %v2298_v2  ;;  %v1051_v6 = vpop.xlane.xlu1 %1050  ;;  %v1288_v33 = vpop.xlane.xlu2 %1287  ;;  %v1128_v2 = vsel %vm730_vm1, %v2335_v38, 0.0 }
 0x296   : > { %v3411_v43 = vmax.f32 %v3398_v15, %v1051_v6  ;;  %v3414_v55 = vmax.f32 %v3294_v9, %v1288_v33 }
 0x298   : > { %v2339_v59 = vpop.eup %2338  ;;  %v1318_v51 = vsub.f32 %v3294_v9, %v3414_v55  ;;  %v1091_v62 = vsub.f32 %v3239_v37, %v3411_v43  ;;  %v1342_v63 = vsub.f32 %v3219_v28, %v3414_v55 }
 0x299   : > { %2087 = vmatmul.msk.f32.gmra.mxu0 %vm730_vm1, %v2339_v59  ;;  %v895_v7 = vsel %vm730_vm1, %v2339_v59, 0.0 }
 0x29a   : > { %1132 = vadd.xlane.f32.xlu1 %v1131_v25  ;;  %896 = vadd.xlane.f32.xlu0 %v895_v7  ;;  %v1106_v0 = vmul.f32 1.442695, %v1091_v62  ;;  %v2341_v37 = vpop.eup %2340  ;;  %v1350_v14 = vmul.f32 1.442695, %v1342_v63 }
 0x29b   : > { %v1134_v34 = vsel %vm730_vm1, %v2341_v37, 0.0 }
 0x29c   : > { %2103 = vmatmul.msk.f32.gmra.mxu2 %vm730_vm1, %v2337_v50  ;;  %2342 = vpow2.f32 %v1106_v0 }
 0x29d   : > { %v1294_v20 = vpop.xlane.xlu1 %1293  ;;  %v1291_v27 = vpop.xlane.xlu2 %1290  ;;  %2344 = vpow2.f32 %v1350_v14 }
 0x29e   : > { %v3429_v18 = vmax.f32 %v3327_v48, %v1294_v20  ;;  %v3432_v3 = vmax.f32 %v3308_v26, %v1291_v27 }
 0x2a0   : > { %v1319_v31 = vsub.f32 %v3308_v26, %v3432_v3  ;;  %v1344_v28 = vsub.f32 %v3235_v36, %v3429_v18  ;;  %v1343_v24 = vsub.f32 %v3227_v32, %v3432_v3 }
 0x2a2   : > { %1135 = vadd.xlane.f32.xlu1 %v1134_v34  ;;  %1129 = vadd.xlane.f32.xlu0 %v1128_v2  ;;  %v1354_v5 = vmul.f32 1.442695, %v1344_v28  ;;  %v2343_v59 = vpop.eup %2342  ;;  %v1352_v62 = vmul.f32 1.442695, %v1343_v24 }
 0x2a3   : > { %v1137_v63 = vsel %vm730_vm1, %v2343_v59, 0.0  ;;  %v3453_v20 = vpop.eup %2344 }
 0x2a4   : > { %2104 = vmatmul.msk.f32.gmra.mxu2 %vm730_vm1, %v2341_v37  ;;  %2346 = vpow2.f32 %v1354_v5 }
 0x2a5   : > { %v1544_v6 = vpop.xlane.xlu1 %1543  ;;  %v2301_v50 = vpop.permute.xlu2 %2300  ;;  %2348 = vpow2.f32 %v1352_v62 }
 0x2a6   : > { %v3446_v33 = vmax.f32 %v3414_v55, %v1544_v6  ;;  %v2302_v36 = vunpack.i.l.bf16 %v2301_v50  ;;  %v2303_v7 = vunpack.i.h.bf16 %v2301_v50 }
 0x2a8   : > { %v1598_v25 = vsub.f32 %v3247_v41, %v3446_v33  ;;  %1458 = vmatpush.msra.mxu0 %v2302_v36 }
 0x2aa   : > { %v1606_v32 = vmul.f32 1.442695, %v1598_v25  ;;  %1138 = vadd.xlane.f32.xlu0 %v1137_v63  ;;  %1459 = vmatpush.msra.mxu0 %v2303_v7  ;;  %v2347_v27 = vpop.eup %2346 }
 0x2ab   : > { %2116 = vmatmul.msk.f32.vlgmr.msra.gmra.mxu0 %vm730_vm1, %v3453_v20  ;;  %v3465_v28 = vpop.eup %2348  ;;  %v1380_v34 = vsel %vm730_vm1, %v2347_v27, 0.0 }
 0x2ac   : > { %2105 = vmatmul.msk.f32.gmra.mxu2 %vm730_vm1, %v2343_v59  ;;  %2350 = vpow2.f32 %v1606_v32 }
 0x2ad   : > { %v1297_v0 = vpop.xlane.xlu1 %1296 }
 0x2ae   : > { %v3459_v41 = vmax.f32 %v3366_v35, %v1297_v0 }
 0x2b0   : > { %v1345_v14 = vsub.f32 %v3245_v40, %v3459_v41 }
 0x2b2   : > { %v1356_v2 = vmul.f32 1.442695, %v1345_v14  ;;  %v3468_v24 = vpop.eup %2350  ;;  %1381 = vadd.xlane.f32.xlu0 %v1380_v34 }
 0x2b3   : > { %2117 = vmatmul.msk.f32.gmra.mxu0 %vm730_vm1, %v3465_v28 }
 0x2b4   : > { %2134 = vmatmul.msk.f32.vlgmr.msra.gmra.mxu2 %vm730_vm1, %v3468_v24  ;;  %2352 = vpow2.f32 %v1356_v2 }
 0x2b5   : > { %v1547_v6 = vpop.xlane.xlu1 %1546 }
 0x2b6   : > { %v3475_v5 = vmax.f32 %v3432_v3, %v1547_v6 }
 0x2b8   : > { %v1599_v50 = vsub.f32 %v3255_v45, %v3475_v5 }
 0x2ba   : > { %v2353_v59 = vpop.eup %2352  ;;  %v1608_v36 = vmul.f32 1.442695, %v1599_v50 }
 0x2bb   : > { %v1553_v62 = vpop.xlane.xlu0 %1552  ;;  %v1383_v25 = vsel %vm730_vm1, %v2353_v59, 0.0  ;;  %2118 = vmatmul.msk.f32.gmra.mxu0 %vm730_vm1, %v2347_v27 }
 0x2bc   : > { %v3483_v7 = vmax.f32 %v3459_v41, %v1553_v62  ;;  %1384 = vadd.xlane.f32.xlu2 %v1383_v25  ;;  %2354 = vpow2.f32 %v1608_v36 }
 0x2bd   : > { %v1550_v32 = vpop.xlane.xlu1 %1549 }
 0x2be   : > { %v3489_v0 = vmax.f32 %v3429_v18, %v1550_v32  ;;  %v1601_v50 = vsub.f32 %v3271_v53, %v3483_v7 }
 0x2c0   : > { %v1600_v14 = vsub.f32 %v3263_v49, %v3489_v0  ;;  %v1612_v32 = vmul.f32 1.442695, %v1601_v50 }
 0x2c2   : > { %v1610_v34 = vmul.f32 1.442695, %v1600_v14  ;;  %v3495_v2 = vpop.eup %2354  ;;  %v820_v14 = vsub.f32 -inf, %v3283_v61  ;;  %v822_v61 = vsub.f32 -inf, %v3324_v46 }
 0x2c3   : > { %v1309_v6 = vpop.xlane.xlu0 %1308  ;;  %2119 = vmatmul.msk.f32.gmra.mxu0 %vm730_vm1, %v2353_v59  ;;  %2135 = vmatmul.msk.f32.gmra.mxu2 %vm730_vm1, %v3495_v2 }
 0x2c4   : > { %v3498_v27 = vmax.f32 %v3411_v43, %v1309_v6  ;;  %2356 = vpow2.f32 %v1610_v34  ;;  %v834_v37 = vmul.f32 1.442695, %v822_v61 }
 0x2c5   : > { %v1303_v36 = vpop.xlane.xlu1 %1302 }
 0x2c6   : > { %v3508_v62 = vmax.f32 %v3382_v56, %v1303_v36  ;;  %v830_v36 = vmul.f32 1.442695, %v820_v14 }
 0x2c8   : > { %v1347_v59 = vsub.f32 %v3259_v47, %v3508_v62 }
 0x2ca   : > { %v1360_v6 = vmul.f32 1.442695, %v1347_v59  ;;  %v2357_v40 = vpop.eup %2356 }
 0x2cb   : > { %2136 = vmatmul.msk.f32.gmra.mxu2 %vm730_vm1, %v2357_v40  ;;  %v1636_v53 = vsel %vm730_vm1, %v2357_v40, 0.0  ;;  %v1072_v40 = vmul.f32 1.442695, %v1062_v54 }
 0x2cc   : > { %2358 = vpow2.f32 %v1360_v6  ;;  %1637 = vadd.xlane.f32.xlu0 %v1636_v53  ;;  %v819_v53 = vsub.f32 -inf, %v3186_v12 }
 0x2cd   : > { %2360 = vpow2.f32 %v1612_v32  ;;  %v1306_v34 = vpop.xlane.xlu1 %1305  ;;  %v3531_v32 = vpop.f32.mrf.mxu0 }
 0x2ce   : > { %v3518_v63 = vmax.f32 %v3396_v11, %v1306_v34  ;;  %2362 = vpow2.f32 %v830_v36  ;;  %v821_v34 = vsub.f32 -inf, %v3305_v23  ;;  %v828_v49 = vmul.f32 1.442695, %v819_v53 }
 0x2d0   : > { %v1348_v50 = vsub.f32 %v3267_v52, %v3518_v63  ;;  %v832_v25 = vmul.f32 1.442695, %v821_v34 }
 0x2d2   : > { %v3524_v59 = vpop.eup %2358  ;;  %v1362_v38 = vmul.f32 1.442695, %v1348_v50  ;;  %v1349_v50 = vsub.f32 %v3277_v58, %v3498_v27 }
 0x2d3   : > { %v3526_v45 = vpop.eup %2360  ;;  %v1389_v14 = vsel %vm730_vm1, %v3524_v59, 0.0 }
 0x2d4   : > { %2137 = vmatmul.msk.f32.gmra.mxu2 %vm730_vm1, %v3526_v45  ;;  %2364 = vpow2.f32 %v1362_v38  ;;  %1390 = vadd.xlane.f32.xlu0 %v1389_v14  ;;  %v2363_v6 = vpop.eup %2362  ;;  %v1364_v53 = vmul.f32 1.442695, %v1349_v50  ;;  %v1064_v50 = vsub.f32 %v3324_v46, %v3369_v39 }
 0x2d5   : > { %v1556_v52 = vpop.xlane.xlu1 %1555  ;;  %2366 = vpow2.f32 %v1072_v40  ;;  %v3542_v36 = vmul.f32 0.0, %v2363_v6  ;;  %v1119_v40 = vsel %vm730_vm1, %v3338_v60, 0.0  ;;  %v1326_v60 = vmul.f32 1.442695, %v1318_v51 }
 0x2d6   : > { %2368 = vpow2.f32 %v828_v49 }
 0x2d7   : > { %2370 = vpow2.f32 %v832_v25  ;;  %v1630_v25 = vsel %vm730_vm1, %v3468_v24, 0.0 }
 0x2d8   : > { %2372 = vpow2.f32 %v834_v37 }
 0x2d9   : > { %2374 = vpow2.f32 %v1364_v53  ;;  %v1061_v53 = vsub.f32 %v3186_v12, %v3308_v26 }
 0x2da   : > { %v3540_v54 = vpop.eup %2364  ;;  %v953_v47 = vpop.f32.mrf.mxu0  ;;  %2376 = vpow2.f32 %v1326_v60 }
 0x2db   : > { %v1392_v38 = vsel %vm730_vm1, %v3540_v54, 0.0  ;;  %v973_v14 = vadd.f32 %v953_v47, %v3542_v36  ;;  %v3551_v22 = vpop.eup %2366 }
 0x2dc   : > { %1393 = vadd.xlane.f32.xlu1 %v1392_v38  ;;  %1120 = vadd.xlane.f32.xlu0 %v1119_v40  ;;  %v2369_v46 = vpop.eup %2368 }
 0x2dd   : > { %v1559_v6 = vpop.xlane.xlu1 %1558  ;;  %v3557_v30 = vmul.f32 %v3551_v22, %v973_v14 }
 0x2de   : > { %v3554_v29 = vmax.f32 %v3508_v62, %v1559_v6  ;;  %v1300_v58 = vpop.xlane.xlu2 %1299 }
 0x2df   : > { %v3560_v47 = vmax.f32 %v3369_v39, %v1300_v58  ;;  %v1118_v40 = vpop.xlane.xlu0 %1117  ;;  %v2371_v58 = vpop.eup %2370 }
 0x2e0   : > { %v1579_v34 = vsub.f32 %v3508_v62, %v3554_v29  ;;  %v1603_v61 = vsub.f32 %v3302_v13, %v3554_v29  ;;  %v2373_v60 = vpop.eup %2372 }
 0x2e1   : > { %v1346_v49 = vsub.f32 %v3253_v44, %v3560_v47  ;;  %v3574_v38 = vmax.f32 %v3560_v47, %v1556_v52  ;;  %v1633_v44 = vsel %vm730_vm1, %v3495_v2, 0.0  ;;  %v1076_v52 = vmul.f32 1.442695, %v1064_v50  ;;  %v3593_v50 = vpop.eup %2374 }
 0x2e2   : > { %v1616_v14 = vmul.f32 1.442695, %v1603_v61 }
 0x2e3   : > { %v1358_v9 = vmul.f32 1.442695, %v1346_v49  ;;  %v1602_v13 = vsub.f32 %v3287_v1, %v3574_v38  ;;  %v1074_v1 = vmul.f32 1.442695, %v1063_v42  ;;  %v2377_v42 = vpop.eup %2376 }
 0x2e4   : > { %1631 = vadd.xlane.f32.xlu1 %v1630_v25  ;;  %2378 = vpow2.f32 %v1616_v14  ;;  %1634 = vadd.xlane.f32.xlu0 %v1633_v44  ;;  %v1070_v14 = vmul.f32 1.442695, %v1061_v53  ;;  %v1395_v25 = vsel %vm730_vm1, %v3593_v50, 0.0 }
 0x2e5   : > { %v1614_v37 = vmul.f32 1.442695, %v1602_v13  ;;  %v1562_v6 = vpop.xlane.xlu1 %1561  ;;  %2380 = vpow2.f32 %v1358_v9 }
 0x2e6   : > { %v3590_v24 = vmax.f32 %v3518_v63, %v1562_v6  ;;  %v876_v2 = vpop.xlane.xlu2 %875 }
 0x2e7   : > { %2382 = vpow2.f32 %v1614_v37  ;;  %v898_v61 = vadd.f32 %v876_v2, %v3344_v17  ;;  %v823_v17 = vsub.f32 -inf, %v3346_v4  ;;  %v870_v2 = vmul.f32 0.0, %v2373_v60 }
 0x2e8   : > { %v1604_v12 = vsub.f32 %v3322_v10, %v3590_v24  ;;  %2384 = vpow2.f32 %v1076_v52 }
 0x2e9   : > { %v1108_v23 = vmul.f32 %v3353_v16, %v898_v61  ;;  %2386 = vpow2.f32 %v1074_v1  ;;  %v869_v1 = vmul.f32 0.0, %v2371_v58  ;;  %v836_v51 = vmul.f32 1.442695, %v823_v17 }
 0x2ea   : > { %v1618_v9 = vmul.f32 1.442695, %v1604_v12  ;;  %v2379_v13 = vpop.eup %2378 }
 0x2eb   : > { %v1140_v44 = vadd.f32 %v1118_v40, %v1108_v23  ;;  %v2381_v37 = vpop.eup %2380  ;;  %v1645_v6 = vsel %vm730_vm1, %v2379_v13, 0.0  ;;  %v1328_v40 = vmul.f32 1.442695, %v1319_v31 }
 0x2ec   : > { %1396 = vadd.xlane.f32.xlu1 %v1395_v25  ;;  %2388 = vpow2.f32 %v1618_v9  ;;  %1646 = vadd.xlane.f32.xlu0 %v1645_v6  ;;  %v1386_v53 = vsel %vm730_vm1, %v2381_v37, 0.0 }
 0x2ed   : > { %v3604_v10 = vpop.eup %2382  ;;  %2120 = vmatmul.msk.f32.gmra.mxu0 %vm730_vm1, %v2381_v37  ;;  %v1565_v16 = vpop.xlane.xlu1 %1564  ;;  %v3608_v61 = vmul.f32 %v2377_v42, %v1140_v44  ;;  %1387 = vadd.xlane.f32.xlu2 %v1386_v53  ;;  %2390 = vpow2.f32 %v1070_v14  ;;  %v867_v37 = vmul.f32 0.0, %v2369_v46 }
 0x2ee   : > { %v888_v52 = vpop.xlane.xlu0 %887  ;;  %v3614_v12 = vmax.f32 %v3498_v27, %v1565_v16  ;;  %v956_v23 = vpop.f32.mrf.mxu0  ;;  %2138 = vmatmul.msk.f32.gmra.mxu2 %vm730_vm1, %v3604_v10  ;;  %2392 = vpow2.f32 %v1328_v40 }
 0x2ef   : > { %v902_v60 = vadd.f32 %v888_v52, %v870_v2  ;;  %v1205_v9 = vpop.f32.mrf.mxu2  ;;  %v2385_v25 = vpop.eup %2384  ;;  %v974_v58 = vadd.f32 %v956_v23, %v869_v1  ;;  %v972_v14 = vadd.f32 %v3531_v32, %v867_v37  ;;  %2394 = vpow2.f32 %v836_v51 }
 0x2f0   : > { %v1229_v44 = vadd.f32 %v1205_v9, %v3356_v19  ;;  %v882_v6 = vpop.xlane.xlu2 %881  ;;  %v2387_v26 = vpop.eup %2386  ;;  %v1605_v16 = vsub.f32 %v3348_v8, %v3614_v12  ;;  %v824_v8 = vsub.f32 -inf, %v3384_v57  ;;  %v3887_v51 = vsub.f32 %v3327_v48, %v3429_v18 }
 0x2f1   : > { %v900_v52 = vadd.f32 %v882_v6, %v3542_v36  ;;  %v3624_v53 = vmul.f32 %v2385_v25, %v902_v60  ;;  %v3627_v49 = vmul.f32 %v2387_v26, %v974_v58  ;;  %v1078_v36 = vmul.f32 1.442695, %v1065_v21 }
 0x2f2   : > { %v3629_v46 = vmul.f32 %v2377_v42, %v1229_v44  ;;  %v1620_v19 = vmul.f32 1.442695, %v1605_v16  ;;  %v2389_v23 = vpop.eup %2388  ;;  %v1330_v40 = vmul.f32 1.442695, %v3887_v51  ;;  %v838_v16 = vmul.f32 1.442695, %v824_v8 }
 0x2f3   : > { %v1110_v17 = vmul.f32 %v3551_v22, %v900_v52  ;;  %v2391_v9 = vpop.eup %2390  ;;  %v1648_v31 = vsel %vm730_vm1, %v2389_v23, 0.0  ;;  %v1639_v22 = vsel %vm730_vm1, %v3526_v45, 0.0  ;;  %v3889_v51 = vsub.f32 %v3366_v35, %v3459_v41 }
 0x2f4   : > { %2396 = vpow2.f32 %v1620_v19  ;;  %1649 = vadd.xlane.f32.xlu1 %v1648_v31  ;;  %v1149_v42 = vmul.f32 %v2391_v9, %v972_v14  ;;  %v3645_v31 = vpop.eup %2392  ;;  %v3890_v35 = vsub.f32 %v3398_v15, %v3411_v43 }
 0x2f5   : > { %2121 = vmatmul.msk.f32.gmra.mxu0 %vm730_vm1, %v3524_v59  ;;  %v879_v32 = vpop.xlane.xlu1 %878  ;;  %1640 = vadd.xlane.f32.xlu2 %v1639_v22  ;;  %v2395_v45 = vpop.eup %2394  ;;  %2398 = vpow2.f32 %v1078_v36 }
 0x2f6   : > { %v899_v60 = vadd.f32 %v879_v32, %v867_v37  ;;  %v959_v58 = vpop.f32.mrf.mxu0  ;;  %2139 = vmatmul.msk.f32.gmra.mxu2 %vm730_vm1, %v2379_v13  ;;  %2400 = vpow2.f32 %v1330_v40  ;;  %v825_v32 = vsub.f32 -inf, %v3398_v15  ;;  %v1332_v40 = vmul.f32 1.442695, %v3889_v51 }
 0x2f7   : > { %v1208_v44 = vpop.f32.mrf.mxu2  ;;  %v975_v4 = vadd.f32 %v959_v58, %v870_v2  ;;  %v871_v2 = vmul.f32 0.0, %v2395_v45  ;;  %2402 = vpow2.f32 %v838_v16  ;;  %v1082_v16 = vmul.f32 1.442695, %v3890_v35 }
 0x2f8   : > { %v1230_v21 = vadd.f32 %v1208_v44, %v1149_v42  ;;  %v885_v6 = vpop.xlane.xlu2 %884  ;;  %v3647_v52 = vmul.f32 %v2391_v9, %v899_v60  ;;  %v3888_v9 = vsub.f32 %v3384_v57, %v3396_v11  ;;  %v840_v57 = vmul.f32 1.442695, %v825_v32 }
 0x2f9   : > { %v901_v59 = vadd.f32 %v885_v6, %v869_v1  ;;  %v3649_v14 = vmul.f32 %v2385_v25, %v975_v4  ;;  %v1642_v25 = vsel %vm730_vm1, %v3604_v10, 0.0  ;;  %v3891_v45 = vsub.f32 %v3382_v56, %v3508_v62 }
 0x2fa   : > { %v3652_v48 = vmul.f32 %v3645_v31, %v1230_v21  ;;  %v2397_v19 = vpop.eup %2396  ;;  %v3892_v56 = vsub.f32 %v3396_v11, %v3518_v63 }
 0x2fb   : > { %v1111_v37 = vmul.f32 %v2387_v26, %v901_v59  ;;  %v1651_v13 = vsel %vm730_vm1, %v2397_v19, 0.0  ;;  %v1080_v26 = vmul.f32 1.442695, %v3888_v9  ;;  %v2399_v42 = vpop.eup %2398 }
 0x2fc   : > { %1652 = vadd.xlane.f32.xlu1 %v1651_v13  ;;  %v2401_v10 = vpop.eup %2400  ;;  %v1336_v13 = vmul.f32 1.442695, %v3891_v45 }
 0x2fd   : > { %2122 = vmatmul.msk.f32.gmra.mxu0 %vm730_vm1, %v3540_v54  ;;  %v891_v1 = vpop.xlane.xlu1 %890  ;;  %1643 = vadd.xlane.f32.xlu2 %v1642_v25  ;;  %v2403_v59 = vpop.eup %2402  ;;  %2404 = vpow2.f32 %v1080_v26 }
 0x2fe   : > { %v903_v8 = vadd.f32 %v891_v1, %v871_v2  ;;  %v962_v36 = vpop.f32.mrf.mxu0  ;;  %2140 = vmatmul.msk.f32.gmra.mxu2 %vm730_vm1, %v2389_v23  ;;  %2406 = vpow2.f32 %v1332_v40 }
 0x2ff   : > { %v1211_v22 = vpop.f32.mrf.mxu2  ;;  %v976_v54 = vadd.f32 %v962_v36, %v871_v2  ;;  %2408 = vpow2.f32 %v840_v57  ;;  %v1338_v36 = vmul.f32 1.442695, %v3892_v56  ;;  %v3894_v56 = vsub.f32 %v3429_v18, %v3489_v0 }
 0x300   : > { %v1231_v60 = vadd.f32 %v1211_v22, %v3557_v30  ;;  %v1124_v58 = vpop.xlane.xlu2 %1123  ;;  %v1113_v4 = vmul.f32 %v2399_v42, %v903_v8  ;;  %v872_v30 = vmul.f32 0.0, %v2403_v59  ;;  %2410 = vpow2.f32 %v1082_v16 }
 0x301   : > { %v1142_v44 = vadd.f32 %v1124_v58, %v1110_v17  ;;  %v3668_v21 = vmul.f32 %v2399_v42, %v976_v54  ;;  %v1374_v17 = vsel %vm730_vm1, %v3453_v20, 0.0  ;;  %v1322_v8 = vsub.f32 %v3369_v39, %v3560_v47 }
 0x302   : > { %v3670_v6 = vmul.f32 %v2401_v10, %v1231_v60  ;;  %2412 = vpow2.f32 %v1336_v13  ;;  %v3896_v18 = vsub.f32 %v3459_v41, %v3483_v7 }
 0x303   : > { %v3672_v23 = vmul.f32 %v2401_v10, %v1142_v44  ;;  %v2405_v25 = vpop.eup %2404  ;;  %v1334_v42 = vmul.f32 1.442695, %v1322_v8  ;;  %2414 = vpow2.f32 %v1338_v36 }
 0x304   : > { %v2407_v9 = vpop.eup %2406  ;;  %v1588_v0 = vmul.f32 1.442695, %v3896_v18 }
 0x305   : > { %2123 = vmatmul.msk.f32.gmra.mxu0 %vm730_vm1, %v3593_v50  ;;  %v894_v2 = vpop.xlane.xlu1 %893  ;;  %1375 = vadd.xlane.f32.xlu2 %v1374_v17  ;;  %v2409_v50 = vpop.eup %2408  ;;  %2416 = vpow2.f32 %v1334_v42 }
 0x306   : > { %2141 = vmatmul.msk.f32.gmra.mxu2 %vm730_vm1, %v2397_v19  ;;  %v904_v32 = vadd.f32 %v894_v2, %v872_v30  ;;  %v873_v22 = vmul.f32 0.0, %v2409_v50  ;;  %v1377_v19 = vsel %vm730_vm1, %v3465_v28, 0.0  ;;  %v2411_v40 = vpop.eup %2410  ;;  %v3893_v28 = vsub.f32 %v3411_v43, %v3498_v27 }
 0x308   : > { %v1127_v1 = vpop.xlane.xlu2 %1126  ;;  %v1114_v26 = vmul.f32 %v2405_v25, %v904_v32  ;;  %v2413_v10 = vpop.eup %2412  ;;  %v1340_v17 = vmul.f32 1.442695, %v3893_v28 }
 0x309   : > { %v1143_v15 = vadd.f32 %v1127_v1, %v1111_v37  ;;  %v2415_v13 = vpop.eup %2414 }
 0x30a   : > { %2418 = vpow2.f32 %v1340_v17 }
 0x30b   : > { %v3687_v20 = vmul.f32 %v2407_v9, %v1143_v15  ;;  %v2417_v1 = vpop.eup %2416 }
 0x30d   : > { %v1133_v37 = vpop.xlane.xlu1 %1132  ;;  %v897_v51 = vpop.xlane.xlu0 %896  ;;  %1378 = vadd.xlane.f32.xlu2 %v1377_v19 }
 0x30e   : > { %v1145_v54 = vadd.f32 %v1133_v37, %v1113_v4  ;;  %v905_v60 = vadd.f32 %v897_v51, %v873_v22  ;;  %v965_v58 = vpop.f32.mrf.mxu0  ;;  %v1214_v39 = vpop.f32.mrf.mxu2 }
 0x30f   : > { %v977_v44 = vadd.f32 %v965_v58, %v872_v30  ;;  %v1232_v57 = vadd.f32 %v1214_v39, %v3627_v49 }
 0x310   : > { %v1115_v59 = vmul.f32 %v2411_v40, %v905_v60  ;;  %v3695_v11 = vmul.f32 %v2413_v10, %v1145_v54  ;;  %v2419_v42 = vpop.eup %2418 }
 0x311   : > { %v1154_v35 = vmul.f32 %v2405_v25, %v977_v44  ;;  %v3697_v16 = vmul.f32 %v2407_v9, %v1232_v57 }
 0x315   : > { %v1136_v4 = vpop.xlane.xlu1 %1135  ;;  %v1130_v45 = vpop.xlane.xlu0 %1129 }
 0x316   : > { %v1146_v2 = vadd.f32 %v1136_v4, %v1114_v26  ;;  %v1144_v30 = vadd.f32 %v1130_v45, %v3624_v53  ;;  %v968_v32 = vpop.f32.mrf.mxu0  ;;  %v1586_v26 = vmul.f32 1.442695, %v3894_v56 }
 0x317   : > { %v1217_v49 = vpop.f32.mrf.mxu2  ;;  %v978_v15 = vadd.f32 %v968_v32, %v873_v22 }
 0x318   : > { %v1233_v50 = vadd.f32 %v1217_v49, %v3649_v14  ;;  %v3704_v25 = vmul.f32 %v2415_v13, %v1146_v2  ;;  %v3706_v9 = vmul.f32 %v2417_v1, %v1144_v30  ;;  %v3895_v14 = vsub.f32 %v3414_v55, %v3446_v33 }
 0x319   : > { %v1155_v8 = vmul.f32 %v2411_v40, %v978_v15  ;;  %2420 = vpow2.f32 %v1586_v26  ;;  %v3897_v55 = vsub.f32 %v3432_v3, %v3475_v5  ;;  %v3898_v26 = vsub.f32 %v3518_v63, %v3590_v24 }
 0x31a   : > { %v3708_v43 = vmul.f32 %v2417_v1, %v1233_v50  ;;  %v1582_v37 = vmul.f32 1.442695, %v3895_v14 }
 0x31b   : > { %v1584_v33 = vmul.f32 1.442695, %v3897_v55  ;;  %v3900_v55 = vsub.f32 %v3560_v47, %v3574_v38 }
 0x31c   : > { %2422 = vpow2.f32 %v1582_v37 }
 0x31d   : > { %v1139_v36 = vpop.xlane.xlu0 %1138  ;;  %2424 = vpow2.f32 %v1588_v0 }
 0x31e   : > { %v1147_v53 = vadd.f32 %v1139_v36, %v1115_v59  ;;  %2426 = vpow2.f32 %v1584_v33  ;;  %v1594_v36 = vmul.f32 1.442695, %v3898_v26 }
 0x31f   : > { %v1220_v19 = vpop.f32.mrf.mxu2  ;;  %v2421_v39 = vpop.eup %2420 }
 0x320   : > { %v1234_v22 = vadd.f32 %v1220_v19, %v3668_v21  ;;  %v3717_v51 = vmul.f32 %v2419_v42, %v1147_v53 }
 0x322   : > { %v3719_v40 = vmul.f32 %v2413_v10, %v1234_v22  ;;  %v3731_v28 = vpop.eup %2422 }
 0x323   : > { %v2425_v4 = vpop.eup %2424 }
 0x325   : > { %v1382_v54 = vpop.xlane.xlu0 %1381 }
 0x326   : > { %v1400_v60 = vadd.f32 %v1382_v54, %v3672_v23 }
 0x327   : > { %v1223_v58 = vpop.f32.mrf.mxu2 }
 0x328   : > { %v1235_v21 = vadd.f32 %v1223_v58, %v1154_v35  ;;  %v1461_v44 = vpop.f32.mrf.mxu0  ;;  %v1624_v57 = vmul.f32 %v2421_v39, %v1400_v60 }
 0x329   : > { %v1485_v10 = vadd.f32 %v1461_v44, %v3629_v46  ;;  %v3738_v46 = vpop.eup %2426 }
 0x32a   : > { %v3729_v59 = vmul.f32 %v2415_v13, %v1235_v21 }
 0x32b   : > { %v1662_v41 = vmul.f32 %v3731_v28, %v1485_v10 }
 0x32f   : > { %v1226_v7 = vpop.f32.mrf.mxu2  ;;  %v1385_v23 = vpop.xlane.xlu2 %1384 }
 0x330   : > { %v1236_v17 = vadd.f32 %v1226_v7, %v1155_v8  ;;  %v1401_v35 = vadd.f32 %v1385_v23, %v3687_v20  ;;  %v1464_v3 = vpop.f32.mrf.mxu0  ;;  %v1592_v20 = vmul.f32 1.442695, %v1579_v34 }
 0x331   : > { %v1486_v5 = vadd.f32 %v1464_v3, %v3652_v48 }
 0x332   : > { %v1625_v45 = vmul.f32 %v2425_v4, %v1401_v35  ;;  %v3736_v2 = vmul.f32 %v2419_v42, %v1236_v17  ;;  %2428 = vpow2.f32 %v1592_v20 }
 0x333   : > { %v1663_v13 = vmul.f32 %v3738_v46, %v1486_v5  ;;  %2430 = vpow2.f32 %v1594_v36 }
 0x337   : > { %v1717_v30 = vpop.f32.mrf.mxu2 }
 0x338   : > { %v3741_v32 = vadd.f32 %v1717_v30, %v1662_v41  ;;  %v1467_v49 = vpop.f32.mrf.mxu0  ;;  %v2429_v14 = vpop.eup %2428 }
 0x339   : > { %v1487_v1 = vadd.f32 %v1467_v49, %v3670_v6 }
 0x33b   : > { %v1664_v15 = vmul.f32 %v2421_v39, %v1487_v1 }
 0x33f   : > { %v1638_v50 = vpop.xlane.xlu0 %1637 }
 0x340   : > { %v1470_v48 = vpop.f32.mrf.mxu0  ;;  %v1656_v53 = vadd.f32 %v1638_v50, %v1624_v57 }
 0x341   : > { %v1488_v8 = vadd.f32 %v1470_v48, %v3697_v16  ;;  %v2431_v16 = vpop.eup %2430 }
 0x342   : > { %2432 = vrcp.f32 %v1656_v53 }
 0x343   : > { %v1665_v56 = vmul.f32 %v2425_v4, %v1488_v8 }
 0x346   : > { %v1720_v19 = vpop.f32.mrf.mxu2 }
 0x347   : > { %v3751_v42 = vadd.f32 %v1720_v19, %v1663_v13  ;;  %v1391_v6 = vpop.xlane.xlu0 %1390 }
 0x348   : > { %v1403_v22 = vadd.f32 %v1391_v6, %v3695_v11  ;;  %v2433_v63 = vpop.eup %2432  ;;  %v3899_v11 = vsub.f32 %v3498_v27, %v3614_v12 }
 0x34a   : > { %v1627_v29 = vmul.f32 %v2429_v14, %v1403_v22  ;;  %v1596_v39 = vmul.f32 1.442695, %v3899_v11 }
 0x34c   : > { %2434 = vpow2.f32 %v1596_v39 }
 0x34e   : > { %v1723_v62 = vpop.f32.mrf.mxu2 }
 0x34f   : > { %v1394_v34 = vpop.xlane.xlu1 %1393  ;;  %v1743_v37 = vadd.f32 %v1723_v62, %v1664_v15  ;;  %v1121_v18 = vpop.xlane.xlu0 %1120 }
 0x350   : > { %v1404_v54 = vadd.f32 %v1394_v34, %v3704_v25  ;;  %v1141_v24 = vadd.f32 %v1121_v18, %v3647_v52  ;;  %v1590_v25 = vmul.f32 1.442695, %v3900_v55 }
 0x351   : > { %v1759_v0 = vmul.f32 %v2433_v63, %v1743_v37 }
 0x352   : > { %v1628_v60 = vmul.f32 %v2431_v16, %v1404_v54  ;;  %v1367_v58 = vmul.f32 %v3645_v31, %v1141_v24  ;;  %2436 = vpow2.f32 %v1590_v25  ;;  %v2435_v44 = vpop.eup %2434 }
 0x353   : > { %1767 = vrot.lane.b32.xlu1 %v1759_v0, %s2783_s14 }
 0x357   : > { %v1632_v21 = vpop.xlane.xlu1 %1631  ;;  %v1635_v7 = vpop.xlane.xlu0 %1634 }
 0x358   : > { %v2437_v41 = vpop.eup %2436  ;;  %v1726_v27 = vpop.f32.mrf.mxu2 }
 0x359   : > { %v1744_v3 = vadd.f32 %v1726_v27, %v1665_v56 }
 0x35f   : > { %v1397_v33 = vpop.xlane.xlu1 %1396  ;;  %v1647_v4 = vpop.xlane.xlu0 %1646 }
 0x360   : > { %v1405_v52 = vadd.f32 %v1397_v33, %v3717_v51  ;;  %v1388_v57 = vpop.xlane.xlu2 %1387  ;;  %v1659_v5 = vadd.f32 %v1647_v4, %v1627_v29 }
 0x361   : > { %v1402_v31 = vadd.f32 %v1388_v57, %v3706_v9  ;;  %v1802_v57 = vld [vmem:[#allocation13 + $0x28] sm:$0xff] }
 0x362   : > { %v1629_v10 = vmul.f32 %v2435_v44, %v1405_v52 }
 0x363   : > { %v1626_v23 = vmul.f32 %v2437_v41, %v1402_v31  ;;  %v1801_v31 = vld [vmem:[#allocation13 + $0x20] sm:$0xff] }
 0x367   : > { %v1650_v20 = vpop.xlane.xlu1 %1649 }
 0x368   : > { %v1641_v12 = vpop.xlane.xlu2 %1640  ;;  %v1660_v50 = vadd.f32 %v1650_v20, %v1628_v60 }
 0x369   : > { %v1657_v17 = vadd.f32 %v1641_v12, %v1625_v45 }
 0x36a   : > { %v1473_v35 = vpop.f32.mrf.mxu0 }
 0x36b   : > { %v1489_v47 = vadd.f32 %v1473_v35, %v3708_v43  ;;  %2438 = vrcp.f32 %v1657_v17 }
 0x36d   : > { %v1666_v38 = vmul.f32 %v2437_v41, %v1489_v47  ;;  %v1798_v41 = vld [vmem:[#allocation13 + $0x8] sm:$0xff] }
 0x36f   : > { %v1653_v62 = vpop.xlane.xlu1 %1652 }
 0x370   : > { %v1644_v51 = vpop.xlane.xlu2 %1643  ;;  %v1661_v37 = vadd.f32 %v1653_v62, %v1629_v10  ;;  %v1800_v10 = vld [vmem:[#allocation13 + $0x18] sm:$0xff] }
 0x371   : > { %v1729_v13 = vpop.f32.mrf.mxu2  ;;  %v2439_v30 = vpop.eup %2438  ;;  %v1658_v49 = vadd.f32 %v1644_v51, %v1626_v23 }
 0x372   : > { %v1476_v9 = vpop.f32.mrf.mxu0  ;;  %v1760_v15 = vmul.f32 %v2439_v30, %v1744_v3  ;;  %v1745_v48 = vadd.f32 %v1729_v13, %v1666_v38  ;;  %v2307_v13 = vld [vmem:[%s3903_s10] ss:$0 sm:$0xff] }
 0x373   : > { %v1490_v1 = vadd.f32 %v1476_v9, %v3719_v40  ;;  %2440 = vrcp.f32 %v1658_v49 }
 0x374   : > { %2442 = vrcp.f32 %v1659_v5 }
 0x375   : > { %v1667_v45 = vmul.f32 %v2429_v14, %v1490_v1  ;;  %2444 = vrcp.f32 %v1660_v50 }
 0x378   : > { %v1376_v43 = vpop.xlane.xlu2 %1375 }
 0x379   : > { %v1732_v8 = vpop.f32.mrf.mxu2  ;;  %v2441_v26 = vpop.eup %2440  ;;  %v1398_v56 = vadd.f32 %v1376_v43, %v3608_v61 }
 0x37a   : > { %v1479_v36 = vpop.f32.mrf.mxu0  ;;  %v1746_v53 = vadd.f32 %v1732_v8, %v1667_v45  ;;  %v2443_v19 = vpop.eup %2442  ;;  %v1761_v6 = vmul.f32 %v2441_v26, %v1745_v48 }
 0x37b   : > { %v1491_v22 = vadd.f32 %v1479_v36, %v3729_v59  ;;  %v1622_v40 = vmul.f32 %v3731_v28, %v1398_v56  ;;  %v2445_v0 = vpop.eup %2444 }
 0x37c   : > { %v1762_v29 = vmul.f32 %v2443_v19, %v1746_v53  ;;  %1775 = vrot.lane.b32.xlu2 %v1761_v6, %s2784_s20 }
 0x37d   : > { %v1668_v14 = vmul.f32 %v2431_v16, %v1491_v22  ;;  %v1654_v34 = vadd.f32 %v1632_v21, %v1622_v40 }
 0x37f   : > { %2446 = vrcp.f32 %v1654_v34 }
 0x380   : > { %v1379_v54 = vpop.xlane.xlu2 %1378  ;;  %2448 = vrcp.f32 %v1661_v37 }
 0x381   : > { %v1735_v18 = vpop.f32.mrf.mxu2  ;;  %v1399_v61 = vadd.f32 %v1379_v54, %v1367_v58 }
 0x382   : > { %v1482_v63 = vpop.f32.mrf.mxu0  ;;  %v1747_v24 = vadd.f32 %v1735_v18, %v1668_v14 }
 0x383   : > { %v1492_v60 = vadd.f32 %v1482_v63, %v3736_v2  ;;  %v1623_v59 = vmul.f32 %v3738_v46, %v1399_v61  ;;  %v1804_v46 = vld [vmem:[#allocation13 + $0x38] sm:$0xff] }
 0x384   : > { %v1763_v28 = vmul.f32 %v2445_v0, %v1747_v24  ;;  %1777 = vrot.lane.b32.xlu2 %v1762_v29, %s2784_s20  ;;  %1823 = vmatpush.msra.mxu3 %v1804_v46  ;;  %s2676_s20 = sshra.s32 %s1858_s16, 4  ;;  %s2677_s20 = int_to_ptr.hbm [resolvable:$true] %s2676_s20 }
 0x385   : > { %v1669_v11 = vmul.f32 %v2435_v44, %v1492_v60  ;;  %v2447_v39 = vpop.eup %2446  ;;  %v1655_v16 = vadd.f32 %v1635_v7, %v1623_v59  ;;  %v1803_v44 = vld [vmem:[#allocation13 + $0x30] sm:$0xff]  ;;  %v1797_v7 = vld [vmem:[#allocation13] sm:$0xff]  ;;  %p2683_p10 = scmp.lt.s32.totalorder %s2677_s20, %s3905_s3 }
 0x386   : > { %1783 = vrot.lane.b32.xlu0 %v1763_v28, %s2785_s11  ;;  %v1757_v21 = vmul.f32 %v2447_v39, %v3741_v32  ;;  %v2449_v25 = vpop.eup %2448  ;;  %1824 = vmatpush.msra.mxu3 %v1803_v44  ;;  %v1799_v32 = vld [vmem:[#allocation13 + $0x10] sm:$0xff] }
 0x387   : > { %2450 = vrcp.f32 %v1655_v16 }
 0x388   : > { %1825 = vmatpush.msra.mxu3 %v1802_v57 }
 0x389   : > { %v1738_v55 = vpop.f32.mrf.mxu2 }
 0x38a   : > { %v1748_v58 = vadd.f32 %v1738_v55, %v1669_v11  ;;  %1826 = vmatpush.msra.mxu3 %v1801_v31 }
 0x38c   : > { %v1764_v33 = vmul.f32 %v2449_v25, %v1748_v58  ;;  %1827 = vmatpush.msra.mxu3 %v1800_v10 }
 0x38d   : > { %v2451_v52 = vpop.eup %2450 }
 0x38e   : > { %1769 = vrot.lane.b32.xlu0 %v1760_v15, %s2783_s14  ;;  %1785 = vrot.lane.b32.xlu1 %v1764_v33, %s2785_s11  ;;  %v1758_v2 = vmul.f32 %v2451_v52, %v3751_v42  ;;  %s1841_s14 = scalar_lea.sflag [#allocation4], %s3036_s5  ;;  %s2678_s11 = scalar_lea.hbm %s2677_s20, 16 }
 0x38f   : > { %1828 = vmatpush.msra.mxu3 %v1799_v32  ;;  %p2679_p1 = scmp.ne.s32.totalorder %s2677_s20, %s2678_s11  ;;  %p2684_p11 = scmp.lt.s32.totalorder %s2682_s30, %s2678_s11 }
 0x391   : > { %1829 = vmatpush.msra.mxu3 %v1798_v41  ;;  %p2680_p4 = pnand %p2679_p1, %p2953_p5  ;;  %p2685_p12 = por %p2684_p11, %p2683_p10 }
 0x393   : > { %1830 = vmatpush.msra.mxu3 %v1797_v7  ;;  %p2681_p8 = pneg %p2680_p4 }
 0x395   : > { %p2686_p13 = pnand %p2685_p12, %p2681_p8 }
 0x3c5   : > { %v1768_v23 = vpop.permute.xlu1 %1767 }
 0x3c6   : > { %v1789_v27 = vsel %vm730_vm1, %v1757_v21, %v1768_v23 }
 0x3d6   : > { %v1776_v42 = vpop.permute.xlu2 %1775 }
 0x3d7   : > { %v1792_v12 = vsel %vm1791_vm2, %v1789_v27, %v1776_v42 }
 0x3de   : > { %v1778_v38 = vpop.permute.xlu2 %1777 }
 0x3f8   : > { %v1784_v17 = vpop.permute.xlu0 %1783 }
 0x3f9   : > { %v1795_v35 = vsel %vm1794_vm3, %v1792_v12, %v1784_v17 }
 0x3fa   : > { %2142 = vmatmul.msk.f32.vlgmr.msra.gmra.mxu3 %vm598_vm0, %v1795_v35 }
 0x400   : > { %v1770_v47 = vpop.permute.xlu0 %1769  ;;  %v1786_v3 = vpop.permute.xlu1 %1785 }
 0x401   : > { %v1790_v4 = vsel %vm730_vm1, %v1758_v2, %v1770_v47 }
 0x402   : > { %v1793_v5 = vsel %vm1791_vm2, %v1790_v4, %v1778_v38 }
 0x403   : > { %v1796_v51 = vsel %vm1794_vm3, %v1793_v5, %v1786_v3 }
 0x404   : > { %2143 = vmatmul.msk.f32.gmra.mxu3 %vm598_vm0, %v1796_v51 }
 0x47d   : > { %v1832_v30 = vpop.f32.mrf.mxu3 }
 0x47e   : > { %v1833_v49 = vadd.f32 %v2307_v13, %v1832_v30 }
 0x480   : > { %1838 = vst.msk [vmem:[%s579_s28] sm:$0xff] %vm598_vm0, %v1833_v49 }
 0x487   : > { %v1835_v9 = vpop.f32.mrf.mxu3 }
 0x488   : > { %v1836_v1 = vadd.f32 %v2307_v13, %v1835_v9 }
 0x48a   : > { %1839 = vst.msk [vmem:[%s579_s28 + $0x8] sm:$0xff] %vm598_vm0, %v1836_v1 }
 0x48b   : > { %2689 = shalt.err (!%p2686_p13)
}
 0x48c   : > { %s2786_s5 = smov 128   ;;  %s2787_s13 = smov 8  }
 0x48d   : > { %2172 = dma.vmem_to_hbm [thread:$0]  (%p2953_p5), %s1856_s29, 256, %s1858_s16, %s1841_s14, %s2786_s5, %s2786_s5, %s2787_s13  }
 0x48e PF: > { %s3906_s17 = sld [smem:[#allocation20_spill]]  ;;  %p2210_p0 = scmp.ge.s32.totalorder %s2772_s24, 2 }
 0x490   : > { %p2198_p3 = pnand %p2210_p0, %p2903_p6 }
 0x492   : > { %p2199_p7 = pneg %p2198_p3 }
 0x494   : > { %s1872_s25 = sand.u32 1, %s3906_s17  }
 0x495   : > { %s1873_s27 = scalar_lea.sflag [#allocation4], %s1872_s25 }
 0x496   : > { %2739 = dma.done.wait (%p2199_p7), %s1873_s27, 256  }
 0x497   : > { %2741 = vsyncadd (%p2199_p7), %s1873_s27, 4294967040  ;;  %s32_s24 = sadd.s32 1, %s2772_s24   ;;  %s3908_s20 = sld [smem:[#allocation23_spill]] }
 0x498   : > { %p29_p9 = scmp.ge.s32.totalorder %s32_s24, 10   ;;  %s3909_s22 = sld [smem:[#allocation25_spill]] }
 0x499   : > { %s3910_s26 = sld [smem:[#allocation27_spill]]  ;;  %s3911_s17 = smov %s2748_s18 }
 0x49a   : > { %s3912_s18 = smov %s2752_s19  ;;  %s3913_s19 = smov %s2979_s15 }
 0x49b   : > { %s3914_s21 = smov %s2768_s23  ;;  %31 = sbr.rel (!%p29_p9) target bundleno = 20 (0x14), region = 149 }
 0x49f   : > { %s3915_s23 = smov %s3910_s26 }
 0x4a0   :  { %1879 = vsyncpa [#allocation3], 1 }
 0x4a1   :  { %1881 = vsyncpa [#allocation3 + $0x1], 1 }
 0x4a2   :  { %1882 = vsyncpa [#allocation6], 1 }
 0x4a3   :  { %1884 = vsyncpa [#allocation6 + $0x1], 1 }
 0x4a4   :  { %1885 = vsyncpa [#allocation9], 1 }
 0x4a5   :  { %1886 = vsyncpa [#allocation12], 1 }
 0x4a6   :  { %1887 = vsyncpa [#allocation4], 1 }
 0x4a7   :  { %1889 = vsyncpa [#allocation4 + $0x1], 1 }

</bundles_post_ra>
